<compile_context>
chip_gen: v6e
topology: v6e:2x2x1
jax: 0.10.0
libtpu: 0.0.40
codegen_flags: <defaults>
</compile_context>

<pallas_src>
import jax
import jax.numpy as jnp
from jax.experimental import pallas as pl
from jax.experimental.pallas import tpu as pltpu

# torch.nn.RReLU() eval-mode negative slope = (lower + upper) / 2 = (1/8 + 1/3) / 2
RRELU_SLOPE = (1.0 / 8.0 + 1.0 / 3.0) / 2.0

_VMEM_BUDGET = 48 << 20   # keep phase-2 working set under this (fits v7x's 64 MiB VMEM)
_VMEM_CAP = 64 << 20      # never ask the compiler for more than v7x physical VMEM


def _round_up(x, m):
    return ((x + m - 1) // m) * m


def _vmem_limit(bytes_needed):
    return int(min(max(int(bytes_needed * 1.5) + (4 << 20), 16 << 20), _VMEM_CAP))


# ----------------------------------------------------------------------------
# Phase 1: sequential matrix-GRU weight evolution (grid=(T,), W carried in VMEM).
# Emits only W_t (bf16) — all N-scaled work lives in the parallel phase 2.
# ----------------------------------------------------------------------------
def _gru_evolve_kernel(gx_ref, gh_ref, uh_ref, b_ref, w0_ref, z_ref, w_out_ref, w_scr):
    t = pl.program_id(0)

    @pl.when(t == 0)
    def _():
        w_scr[...] = w0_ref[...]

    w_prev = w_scr[...]                       # [dp_in, dp_out], exact f32 carry
    d = w_prev.shape[0]

    # Split stacked gate matmuls (no concat, no zero Wh-block FLOPs):
    #   pre_x = [[Wu],[Wr],[Wh]] @ Z_t ,   pre_h = [[Uu],[Ur]] @ W_{t-1}
    pre_x = jnp.dot(gx_ref[...], z_ref[...], preferred_element_type=jnp.float32)
    pre_h = jnp.dot(gh_ref[...], w_prev, preferred_element_type=jnp.float32)
    b = b_ref[...]

    update = jax.nn.sigmoid(pre_x[0:d] + pre_h[0:d] + b[0:d])
    reset = jax.nn.sigmoid(pre_x[d:2 * d] + pre_h[d:2 * d] + b[d:2 * d])
    h_cap = jnp.tanh(
        pre_x[2 * d:3 * d] + b[2 * d:3 * d]
        + jnp.dot(uh_ref[...], reset * w_prev, preferred_element_type=jnp.float32)
    )
    w_new = (1.0 - update) * w_prev + update * h_cap

    w_scr[...] = w_new                               # exact f32 carry across timesteps
    w_out_ref[...] = w_new.astype(w_out_ref.dtype)   # bf16 copy consumed by phase 2


# ----------------------------------------------------------------------------
# Phase 2: fully parallel, row-tiled fused GCN: out = act((adj_tile @ X_t) @ W_t).
# ----------------------------------------------------------------------------
def _gcn_kernel(adj_ref, x_ref, w_ref, out_ref):
    ax = jnp.dot(adj_ref[...], x_ref[...], preferred_element_type=jnp.float32)
    y = jnp.dot(ax.astype(jnp.bfloat16), w_ref[...], preferred_element_type=jnp.float32)
    out_ref[...] = jnp.where(y >= 0, y, RRELU_SLOPE * y).astype(out_ref.dtype)


# ----------------------------------------------------------------------------
# Wrapper.
# ----------------------------------------------------------------------------
def topk_summarize(x_seq, mask_seq, scorer, k):
    """EvolveGCN-H TopK summarizer (plain JAX): [T,N,D_in] -> [T, D_in, k]."""
    norm = jnp.sqrt(jnp.sum(scorer * scorer)) + 1e-6
    scores = jnp.einsum("tnd,d->tn", x_seq, scorer) / norm + mask_seq   # [T, N]
    vals, idx = jax.lax.top_k(scores, k)                                # [T, k]
    gathered = jnp.take_along_axis(x_seq, idx[..., None], axis=1)       # [T, k, D_in]
    z = gathered * jnp.tanh(vals)[..., None]
    return jnp.swapaxes(z, 1, 2)                                        # [T, D_in, k]


def grcu_vh_forward(adj_seq, x_seq, mask_seq, params, *, row_tile=256):
    T, N, _ = adj_seq.shape
    d_in = x_seq.shape[-1]
    d_out = params["w0"].shape[-1]

    # Lane-dense padding (exactly zero-preserving, see kernel invariants).
    dp_in = _round_up(d_in, 128)
    dp_out = _round_up(d_out, 128)

    # Row-tile size: start at row_tile (>=128), shrink until the phase-2 working set
    # fits the VMEM budget.  N is zero-padded to a multiple of tile_m.
    tile_m = max(128, _round_up(min(row_tile, _round_up(N, 128)), 128))
    while True:
        n_pad = _round_up(N, tile_m)
        p2_need = 2 * (tile_m * n_pad * 2 + n_pad * dp_in * 2
                       + dp_in * dp_out * 2 + tile_m * dp_out * 4)
        if p2_need <= _VMEM_BUDGET or tile_m <= 128:
            break
        tile_m = max(128, (tile_m // 2 // 128) * 128)
    # TODO(synk): for very large N (>~32k on v7x) the resident [n_pad, dp_in] X block
    #             alone exceeds VMEM; add a K-tiled phase-2 variant (third "arbitrary"
    #             grid axis + f32 accumulator scratch) when that regime matters.

    # --- cheap wrapper-side prep (plain JAX) --------------------------------
    z_seq = topk_summarize(x_seq, mask_seq, params["p"], d_out)   # [T, d_in, d_out]

    # Stacked gate matrices (zero-padded): gx = [[Wu],[Wr],[Wh]], gh = [[Uu],[Ur]].
    gx = jnp.zeros((3 * dp_in, dp_in), jnp.float32)
    gx = gx.at[0:d_in, 0:d_in].set(params["wu"])
    gx = gx.at[dp_in:dp_in + d_in, 0:d_in].set(params["wr"])
    gx = gx.at[2 * dp_in:2 * dp_in + d_in, 0:d_in].set(params["wh"])

    gh = jnp.zeros((2 * dp_in, dp_in), jnp.float32)
    gh = gh.at[0:d_in, 0:d_in].set(params["uu"])
    gh = gh.at[dp_in:dp_in + d_in, 0:d_in].set(params["ur"])

    b = jnp.zeros((3 * dp_in, dp_out), jnp.float32)
    b = b.at[0:d_in, 0:d_out].set(params["bu"])
    b = b.at[dp_in:dp_in + d_in, 0:d_out].set(params["br"])
    b = b.at[2 * dp_in:2 * dp_in + d_in, 0:d_out].set(params["bh"])

    uh = jnp.zeros((dp_in, dp_in), jnp.float32).at[:d_in, :d_in].set(params["uhh"])
    w0 = jnp.zeros((dp_in, dp_out), jnp.float32).at[:d_in, :d_out].set(params["w0"])

    z_pad = jnp.zeros((T, dp_in, dp_out), jnp.float32).at[:, :d_in, :d_out].set(z_seq)

    # Heavy HBM streams in bf16; pad + cast fused into a single XLA pass each.
    # TODO(synk): if the caller can supply bf16 (or fp8 on v7x) adjacency directly,
    #             this cast pass can be dropped entirely.
    x_pad = jnp.zeros((T, n_pad, dp_in), jnp.bfloat16
                      ).at[:, :N, :d_in].set(x_seq.astype(jnp.bfloat16))
    adj_pad = jnp.zeros((T, n_pad, n_pad), jnp.bfloat16
                        ).at[:, :N, :N].set(adj_seq.astype(jnp.bfloat16))

    def full2d(shape):
        return pl.BlockSpec(shape, lambda t: (0, 0))

    # --- phase 1: sequential weight evolution -------------------------------
    p1_need = (2 * (3 * dp_in * dp_in + 2 * dp_in * dp_in + dp_in * dp_in
                    + 3 * dp_in * dp_out + dp_in * dp_out) * 4     # constants (x2 buf)
               + 2 * dp_in * dp_out * 4                            # Z_t block
               + 2 * dp_in * dp_out * 2                            # W_t out block
               + dp_in * dp_out * 4)                               # carried-W scratch
    # TODO(synk): the constant inputs have a fixed block index; single-buffering them
    #             (pipeline_mode=pl.Buffered(1)) would halve their VMEM footprint.
    w_seq = pl.pallas_call(
        _gru_evolve_kernel,
        out_shape=jax.ShapeDtypeStruct((T, dp_in, dp_out), jnp.bfloat16),
        grid_spec=pltpu.PrefetchScalarGridSpec(
            num_scalar_prefetch=0,
            grid=(T,),
            in_specs=[
                full2d((3 * dp_in, dp_in)),       # gx = [[Wu],[Wr],[Wh]]
                full2d((2 * dp_in, dp_in)),       # gh = [[Uu],[Ur]]
                full2d((dp_in, dp_in)),           # U_h
                full2d((3 * dp_in, dp_out)),      # stacked biases
                full2d((dp_in, dp_out)),          # W_0
                pl.BlockSpec((pl.Squeezed(), dp_in, dp_out), lambda t: (t, 0, 0)),  # Z_t
            ],
            out_specs=pl.BlockSpec((pl.Squeezed(), dp_in, dp_out), lambda t: (t, 0, 0)),
            scratch_shapes=[pltpu.VMEM((dp_in, dp_out), jnp.float32)],  # carried W
        ),
        compiler_params=pltpu.CompilerParams(
            dimension_semantics=("arbitrary",),       # W carried across t -> serial
            vmem_limit_bytes=_vmem_limit(p1_need),
        ),
    )(gx, gh, uh, b, w0, z_pad)

    # --- phase 2: fully parallel, row-tiled fused GCN ------------------------
    out_pad = pl.pallas_call(
        _gcn_kernel,
        out_shape=jax.ShapeDtypeStruct((T, n_pad, dp_out), jnp.float32),
        grid_spec=pltpu.PrefetchScalarGridSpec(
            num_scalar_prefetch=0,
            grid=(T, n_pad // tile_m),
            in_specs=[
                pl.BlockSpec((pl.Squeezed(), tile_m, n_pad), lambda t, i: (t, i, 0)),
                pl.BlockSpec((pl.Squeezed(), n_pad, dp_in), lambda t, i: (t, 0, 0)),
                pl.BlockSpec((pl.Squeezed(), dp_in, dp_out), lambda t, i: (t, 0, 0)),
            ],
            out_specs=pl.BlockSpec((pl.Squeezed(), tile_m, dp_out),
                                   lambda t, i: (t, i, 0)),
        ),
        compiler_params=pltpu.CompilerParams(
            dimension_semantics=("parallel", "parallel"),
            vmem_limit_bytes=_vmem_limit(p2_need),
        ),
    )(adj_pad, x_pad, w_seq)

    return out_pad[:, :N, :d_out]


# ----------------------------------------------------------------------------
# Pure-JAX reference (same math) for verification.
# ----------------------------------------------------------------------------
def grcu_vh_reference(adj_seq, x_seq, mask_seq, p, *, bf16_gcn=True):
    z_seq = topk_summarize(x_seq, mask_seq, p["p"], p["w0"].shape[-1])
    W = p["w0"]
    outs = []
    for t in range(adj_seq.shape[0]):
        x, h = z_seq[t], W
        u = jax.nn.sigmoid(p["wu"] @ x + p["uu"] @ h + p["bu"])
        r = jax.nn.sigmoid(p["wr"] @ x + p["ur"] @ h + p["br"])
        hc = jnp.tanh(p["wh"] @ x + p["uhh"] @ (r * h) + p["bh"])
        W = (1.0 - u) * h + u * hc
        if bf16_gcn:   # mirror the kernel's fused bf16 MXU order: (adj @ X) @ W
            ax = jnp.dot(adj_seq[t].astype(jnp.bfloat16), x_seq[t].astype(jnp.bfloat16),
                         preferred_element_type=jnp.float32)
            y = jnp.dot(ax.astype(jnp.bfloat16), W.astype(jnp.bfloat16),
                        preferred_element_type=jnp.float32)
        else:
            y = adj_seq[t] @ (x_seq[t] @ W)
        outs.append(jnp.where(y >= 0, y, RRELU_SLOPE * y))
    return jnp.stack(outs, axis=0)


# ----------------------------------------------------------------------------
# Deterministic glorot-uniform init (like init_glorot in the repo).
# ----------------------------------------------------------------------------
def _glorot(key, shape):
    r = jnp.sqrt(6.0 / (shape[0] + shape[1]))
    return jax.random.uniform(key, shape, jnp.float32, -r, r)


def init_params(key, d_in, d_out):
    ks = jax.random.split(key, 8)
    return {
        "w0": _glorot(ks[0], (d_in, d_out)),
        "wu": _glorot(ks[1], (d_in, d_in)), "uu": _glorot(ks[2], (d_in, d_in)),
        "wr": _glorot(ks[3], (d_in, d_in)), "ur": _glorot(ks[4], (d_in, d_in)),
        "wh": _glorot(ks[5], (d_in, d_in)), "uhh": _glorot(ks[6], (d_in, d_in)),
        "bu": jnp.zeros((d_in, d_out), jnp.float32),
        "br": jnp.zeros((d_in, d_out), jnp.float32),
        "bh": jnp.zeros((d_in, d_out), jnp.float32),
        "p": _glorot(ks[7], (d_in, 1))[:, 0],   # TopK scorer vector
    }


if __name__ == "__main__":
    # N deliberately not a multiple of 128 to exercise the N-padding path.
    T, N, D_IN, D_OUT = 4, 200, 16, 32

    key = jax.random.PRNGKey(0)
    k_adj, k_x, k_p = jax.random.split(key, 3)

    # Symmetric, row-normalized dense adjacency per timestep.
    raw = jax.random.uniform(k_adj, (T, N, N), jnp.float32)
    adj_seq = (raw + jnp.swapaxes(raw, -1, -2)) * 0.5
    adj_seq = adj_seq / jnp.sum(adj_seq, axis=-1, keepdims=True)

    x_seq = jax.random.normal(k_x, (T, N, D_IN), jnp.float32)
    mask_seq = jnp.zeros((T, N), jnp.float32)   # all nodes present
    params = init_params(k_p, D_IN, D_OUT)

    out = grcu_vh_forward(adj_seq, x_seq, mask_seq, params)
    out = jax.block_until_ready(out)
    assert out.shape == (T, N, D_OUT)

    # Tight check vs a reference with identical numerics (fused bf16 GCN matmuls).
    ref = grcu_vh_reference(adj_seq, x_seq, mask_seq, params, bf16_gcn=True)
    assert jnp.allclose(out, ref, atol=3e-3, rtol=3e-3), "mismatch vs bf16-matched reference"

    # Loose sanity check vs the full-f32 reference (bf16 quantization only).
    ref32 = grcu_vh_reference(adj_seq, x_seq, mask_seq, params, bf16_gcn=False)
    assert jnp.allclose(out, ref32, atol=5e-2, rtol=5e-2), "mismatch vs f32 reference"

    print("KERNEL_OK")
</pallas_src>

<mosaic_0001>
module attributes {stable_mosaic.version = 11 : i64} {
  func.func @_gru_evolve_kernel(%arg0: i32, %arg1: memref<384x128xf32, #tpu.memory_space<vmem>>, %arg2: memref<256x128xf32, #tpu.memory_space<vmem>>, %arg3: memref<128x128xf32, #tpu.memory_space<vmem>>, %arg4: memref<384x128xf32, #tpu.memory_space<vmem>>, %arg5: memref<128x128xf32, #tpu.memory_space<vmem>>, %arg6: memref<1x128x128xf32, #tpu.memory_space<vmem>>, %arg7: memref<1x128x128xbf16, #tpu.memory_space<vmem>>, %arg8: memref<128x128xf32, #tpu.memory_space<vmem>>) attributes {dimension_semantics = [#tpu.dimension_semantics<arbitrary>], iteration_bounds = array<i64: 4>, scalar_prefetch = 0 : i64, scratch_operands = 1 : i64, tpu.core_type = #tpu.core_type<tc>, window_params = [{pipeline_mode = #tpu.pipeline_mode<synchronous>, transform_indices = @transform_0, window_bounds = array<i64: 384, 128>}, {pipeline_mode = #tpu.pipeline_mode<synchronous>, transform_indices = @transform_1, window_bounds = array<i64: 256, 128>}, {pipeline_mode = #tpu.pipeline_mode<synchronous>, transform_indices = @transform_2, window_bounds = array<i64: 128, 128>}, {pipeline_mode = #tpu.pipeline_mode<synchronous>, transform_indices = @transform_3, window_bounds = array<i64: 384, 128>}, {pipeline_mode = #tpu.pipeline_mode<synchronous>, transform_indices = @transform_4, window_bounds = array<i64: 128, 128>}, {transform_indices = @transform_5, window_bounds = array<i64: 1, 128, 128>}, {transform_indices = @transform_6, window_bounds = array<i64: 1, 128, 128>}]} {
    %c0_i32 = arith.constant 0 : i32
    %0 = arith.cmpi eq, %arg0, %c0_i32 : i32
    %1 = arith.extui %0 : i1 to i32
    %c0_i32_0 = arith.constant 0 : i32
    %2 = arith.cmpi ne, %1, %c0_i32_0 : i32
    scf.if %2 {
      %c0_23 = arith.constant 0 : index
      %c0_24 = arith.constant 0 : index
      %49 = vector.load %arg5[%c0_23, %c0_24] : memref<128x128xf32, #tpu.memory_space<vmem>>, vector<128x128xf32>
      %c0_25 = arith.constant 0 : index
      %c0_26 = arith.constant 0 : index
      %50 = vector.load %arg8[%c0_25, %c0_26] : memref<128x128xf32, #tpu.memory_space<vmem>>, vector<128x128xf32>
      tpu.vector_store %arg8[%c0_25, %c0_26], %49 {strides = array<i32>} : memref<128x128xf32, #tpu.memory_space<vmem>>, vector<128x128xf32>,
    } else {
    }
    %c0 = arith.constant 0 : index
    %c0_1 = arith.constant 0 : index
    %3 = vector.load %arg8[%c0, %c0_1] : memref<128x128xf32, #tpu.memory_space<vmem>>, vector<128x128xf32>
    %c0_2 = arith.constant 0 : index
    %c0_3 = arith.constant 0 : index
    %4 = vector.load %arg1[%c0_2, %c0_3] : memref<384x128xf32, #tpu.memory_space<vmem>>, vector<384x128xf32>
    %c0_4 = arith.constant 0 : index
    %c0_5 = arith.constant 0 : index
    %c0_6 = arith.constant 0 : index
    %5 = vector.load %arg6[%c0_4, %c0_5, %c0_6] : memref<1x128x128xf32, #tpu.memory_space<vmem>>, vector<1x128x128xf32>
    %6 = vector.shape_cast %5 : vector<1x128x128xf32> to vector<128x128xf32>
    %cst = arith.constant dense<0.000000e+00> : vector<384x128xf32>
    %7 = tpu.matmul %4, %6, %cst {dimension_numbers = #tpu.dot_dimension_numbers<[1], [0], [0], [1], [0, 0, 1, 1], [], []>} : vector<384x128xf32>, vector<128x128xf32>, vector<384x128xf32> -> vector<384x128xf32>
    %c0_7 = arith.constant 0 : index
    %c0_8 = arith.constant 0 : index
    %8 = vector.load %arg2[%c0_7, %c0_8] : memref<256x128xf32, #tpu.memory_space<vmem>>, vector<256x128xf32>
    %cst_9 = arith.constant dense<0.000000e+00> : vector<256x128xf32>
    %9 = tpu.matmul %8, %3, %cst_9 {dimension_numbers = #tpu.dot_dimension_numbers<[1], [0], [0], [1], [0, 0, 1, 1], [], []>} : vector<256x128xf32>, vector<128x128xf32>, vector<256x128xf32> -> vector<256x128xf32>
    %c0_10 = arith.constant 0 : index
    %c0_11 = arith.constant 0 : index
    %10 = vector.load %arg4[%c0_10, %c0_11] : memref<384x128xf32, #tpu.memory_space<vmem>>, vector<384x128xf32>
    %11 = vector.extract_strided_slice %7 {offsets = [0, 0], sizes = [128, 128], strides = [1, 1]} : vector<384x128xf32> to vector<128x128xf32>
    %12 = vector.extract_strided_slice %9 {offsets = [0, 0], sizes = [128, 128], strides = [1, 1]} : vector<256x128xf32> to vector<128x128xf32>
    %13 = arith.addf %11, %12 : vector<128x128xf32>
    %14 = vector.extract_strided_slice %10 {offsets = [0, 0], sizes = [128, 128], strides = [1, 1]} : vector<384x128xf32> to vector<128x128xf32>
    %15 = arith.addf %13, %14 : vector<128x128xf32>
    %16 = arith.negf %15 : vector<128x128xf32>
    %17 = math.exp %16 : vector<128x128xf32>
    %cst_12 = arith.constant 1.000000e+00 : f32
    %18 = vector.broadcast %cst_12 : f32 to vector<128x128xf32>
    %19 = arith.addf %18, %17 : vector<128x128xf32>
    %20 = arith.divf %18, %19 : vector<128x128xf32>
    %21 = vector.extract_strided_slice %7 {offsets = [128, 0], sizes = [128, 128], strides = [1, 1]} : vector<384x128xf32> to vector<128x128xf32>
    %22 = vector.extract_strided_slice %9 {offsets = [128, 0], sizes = [128, 128], strides = [1, 1]} : vector<256x128xf32> to vector<128x128xf32>
    %23 = arith.addf %21, %22 : vector<128x128xf32>
    %24 = vector.extract_strided_slice %10 {offsets = [128, 0], sizes = [128, 128], strides = [1, 1]} : vector<384x128xf32> to vector<128x128xf32>
    %25 = arith.addf %23, %24 : vector<128x128xf32>
    %26 = arith.negf %25 : vector<128x128xf32>
    %27 = math.exp %26 : vector<128x128xf32>
    %cst_13 = arith.constant 1.000000e+00 : f32
    %28 = vector.broadcast %cst_13 : f32 to vector<128x128xf32>
    %29 = arith.addf %28, %27 : vector<128x128xf32>
    %30 = arith.divf %28, %29 : vector<128x128xf32>
    %31 = vector.extract_strided_slice %7 {offsets = [256, 0], sizes = [128, 128], strides = [1, 1]} : vector<384x128xf32> to vector<128x128xf32>
    %32 = vector.extract_strided_slice %10 {offsets = [256, 0], sizes = [128, 128], strides = [1, 1]} : vector<384x128xf32> to vector<128x128xf32>
    %33 = arith.addf %31, %32 : vector<128x128xf32>
    %c0_14 = arith.constant 0 : index
    %c0_15 = arith.constant 0 : index
    %34 = vector.load %arg3[%c0_14, %c0_15] : memref<128x128xf32, #tpu.memory_space<vmem>>, vector<128x128xf32>
    %35 = arith.mulf %30, %3 : vector<128x128xf32>
    %cst_16 = arith.constant dense<0.000000e+00> : vector<128x128xf32>
    %36 = tpu.matmul %34, %35, %cst_16 {dimension_numbers = #tpu.dot_dimension_numbers<[1], [0], [0], [1], [0, 0, 1, 1], [], []>} : vector<128x128xf32>, vector<128x128xf32>, vector<128x128xf32> -> vector<128x128xf32>
    %37 = arith.addf %33, %36 : vector<128x128xf32>
    %38 = math.tanh %37 : vector<128x128xf32>
    %cst_17 = arith.constant 1.000000e+00 : f32
    %39 = vector.broadcast %cst_17 : f32 to vector<128x128xf32>
    %40 = arith.subf %39, %20 : vector<128x128xf32>
    %41 = arith.mulf %40, %3 : vector<128x128xf32>
    %42 = arith.mulf %20, %38 : vector<128x128xf32>
    %43 = arith.addf %41, %42 : vector<128x128xf32>
    %c0_18 = arith.constant 0 : index
    %c0_19 = arith.constant 0 : index
    %44 = vector.load %arg8[%c0_18, %c0_19] : memref<128x128xf32, #tpu.memory_space<vmem>>, vector<128x128xf32>
    tpu.vector_store %arg8[%c0_18, %c0_19], %43 {strides = array<i32>} : memref<128x128xf32, #tpu.memory_space<vmem>>, vector<128x128xf32>,
    %45 = arith.truncf %43 : vector<128x128xf32> to vector<128x128xbf16>
    %c0_20 = arith.constant 0 : index
    %c0_21 = arith.constant 0 : index
    %c0_22 = arith.constant 0 : index
    %46 = vector.load %arg7[%c0_20, %c0_21, %c0_22] : memref<1x128x128xbf16, #tpu.memory_space<vmem>>, vector<1x128x128xbf16>
    %47 = vector.shape_cast %46 : vector<1x128x128xbf16> to vector<128x128xbf16>
    %48 = vector.shape_cast %45 : vector<128x128xbf16> to vector<1x128x128xbf16>
    tpu.vector_store %arg7[%c0_20, %c0_21, %c0_22], %48 {strides = array<i32>} : memref<1x128x128xbf16, #tpu.memory_space<vmem>>, vector<1x128x128xbf16>,
    return
  }
  func.func @transform_0(%arg0: i32) -> (i32, i32) {
    %c0_i32 = arith.constant 0 : i32
    %c0_i32_0 = arith.constant 0 : i32
    %c0_i32_1 = arith.constant 0 : i32
    return %c0_i32, %c0_i32_0 : i32, i32
  }
  func.func @transform_1(%arg0: i32) -> (i32, i32) {
    %c0_i32 = arith.constant 0 : i32
    %c0_i32_0 = arith.constant 0 : i32
    %c0_i32_1 = arith.constant 0 : i32
    return %c0_i32, %c0_i32_0 : i32, i32
  }
  func.func @transform_2(%arg0: i32) -> (i32, i32) {
    %c0_i32 = arith.constant 0 : i32
    %c0_i32_0 = arith.constant 0 : i32
    %c0_i32_1 = arith.constant 0 : i32
    return %c0_i32, %c0_i32_0 : i32, i32
  }
  func.func @transform_3(%arg0: i32) -> (i32, i32) {
    %c0_i32 = arith.constant 0 : i32
    %c0_i32_0 = arith.constant 0 : i32
    %c0_i32_1 = arith.constant 0 : i32
    return %c0_i32, %c0_i32_0 : i32, i32
  }
  func.func @transform_4(%arg0: i32) -> (i32, i32) {
    %c0_i32 = arith.constant 0 : i32
    %c0_i32_0 = arith.constant 0 : i32
    %c0_i32_1 = arith.constant 0 : i32
    return %c0_i32, %c0_i32_0 : i32, i32
  }
  func.func @transform_5(%arg0: i32) -> (i32, i32, i32) {
    %c0_i32 = arith.constant 0 : i32
    %c0_i32_0 = arith.constant 0 : i32
    %c0_i32_1 = arith.constant 0 : i32
    return %arg0, %c0_i32, %c0_i32_0 : i32, i32, i32
  }
  func.func @transform_6(%arg0: i32) -> (i32, i32, i32) {
    %c0_i32 = arith.constant 0 : i32
    %c0_i32_0 = arith.constant 0 : i32
    %c0_i32_1 = arith.constant 0 : i32
    return %arg0, %c0_i32, %c0_i32_0 : i32, i32, i32
  }
}

</mosaic_0001>

<bundles_post_ra>
// kernel: tpu_custom_call.1
= control target key start
LH: loop header
LB: loop body
LE: loop exit
PB: predicated region body
PF: predicated region fallthrough
CT: control target
= control target key end

     0   :  { %11 = vsyncpa [#allocation4], 0  ;;  %s3433_s0 = inlined_call_operand.hbm [shape: f32[384,128], index: 0, kind: input, shape index: {}]   ;;  %s3434_s1 = inlined_call_operand.hbm [shape: f32[256,128], index: 1, kind: input, shape index: {}]   ;;  %s3435_s2 = inlined_call_operand.hbm [shape: f32[128,128], index: 2, kind: input, shape index: {}]   ;;  %s3436_s3 = inlined_call_operand.hbm [shape: f32[384,128], index: 3, kind: input, shape index: {}]   ;;  %s3437_s4 = inlined_call_operand.hbm [shape: f32[128,128], index: 4, kind: input, shape index: {}]   ;;  %s3438_s5 = inlined_call_operand.hbm [shape: f32[4,128,128], index: 5, kind: input, shape index: {}]   ;;  %s3439_s6 = inlined_call_operand.hbm [shape: bf16[4,128,128], index: 6, kind: output, shape index: {}]  }
   0x1   :  { %12 = vsyncpa [#allocation7], 0 }
   0x2   :  { %13 = vsyncpa [#allocation10], 0 }
   0x3   :  { %14 = vsyncpa [#allocation13], 0 }
   0x4   :  { %16 = vsyncpa [#allocation13 + $0x1], 0 }
   0x5   :  { %17 = vsyncpa [#allocation5], 0 }
   0x6   :  { %19 = vsyncpa [#allocation5 + $0x1], 0  ;;  %s2928_s21 = smov 0   ;;  %s2930_s22 = smov 0  }
   0x7   :  { %s2932_s23 = smov 0   ;;  %s2934_s24 = smov 0  }
   0x8 LB: > { %s2949_s25 = sadd.s32 4294967295, %s2880_s24   ;;  %p1848_p0 = scmp.ge.s32.totalorder %s2880_s24, 1  ;;  %s2880_s24 = sphi %s2934_s24, %s3504_s24   ;;  %s2876_s23 = sphi %s2932_s23, %s3503_s23   ;;  %s2872_s22 = sphi %s2930_s22, %s3502_s22   ;;  %s2868_s21 = sphi %s2928_s21, %s3501_s21  }
   0x9   : > { %p3440_p1 = scmp.eq.s32.totalorder %s2949_s25, 0  ;;  %p187_p2 = scmp.lt.s32.totalorder %s2880_s24, 5 }
   0xa   : > { %s2882_s27 = smov [#allocation6]   ;;  %s2883_s29 = smov [#allocation9]  }
   0xb   : > { %p2955_p4 = pnand %p1848_p0, %p187_p2  ;;  %s212_s28 = sshll.u32 %s2882_s27, 4  ;;  %s213_s28 = int_to_ptr.vmem [resolvable:$true] %s212_s28 }
   0xc   : > { %s238_s30 = sshll.u32 %s2883_s29, 4  ;;  %s2884_s8 = smov [#allocation3]   ;;  %s2967_s30 = int_to_ptr.vmem [resolvable:$true] %s238_s30 }
   0xd   : > { %s3447_s26 = scalar_select %p2955_p4, 1, 0 }
   0xe   : > { %p2393_p5 = pneg %p2955_p4  ;;  %s199_s9 = sshll.u32 %s2884_s8, 4  ;;  %s2969_s9 = int_to_ptr.vmem [resolvable:$true] %s199_s9 }
   0xf   : > { %s2657_s11 = scalar_lea.vmem %s213_s28, 4096  ;;  %p2665_p11 = scmp.lt.s32.totalorder %s213_s28, %s213_s28 }
  0x10   : > { %p2963_p6 = pnand %p2393_p5, %p3440_p1  ;;  %p2658_p8 = scmp.ne.s32.totalorder %s213_s28, %s2657_s11 }
  0x11   : > { %p2666_p12 = scmp.lt.s32.totalorder %s2657_s11, %s2657_s11 }
  0x12   : > { %p2973_p7 = pneg %p2963_p6 }
  0x13   : > { %p2667_p13 = por %p2666_p12, %p2665_p11 }
  0x14   : > { %p2660_p9 = pnand %p2658_p8, %p2973_p7 }
  0x16   : > { %p2661_p10 = pneg %p2660_p9 }
  0x18   : > { %p2668_p0 = pnand %p2667_p13, %p2661_p10 }
  0x1a   : > { %2671 = shalt.err (!%p2668_p0)
}
  0x1b   : > { %s3441_s12 = smov 128   ;;  %s3442_s13 = smov 8  }
  0x1c   : > { %2399 = dma.hbm_to_vmem [thread:$0]  (!%p2963_p6), %s3434_s1, 4096, %s213_s28, [#allocation7], %s3441_s12, %s3441_s12, %s3442_s13  }
  0x1d   : > { %s2683_s16 = scalar_lea.vmem %s2967_s30, 6144  ;;  %p2691_p9 = scmp.lt.s32.totalorder %s2967_s30, %s2967_s30 }
  0x1e   : > { %p2684_p2 = scmp.ne.s32.totalorder %s2967_s30, %s2683_s16  ;;  %p2692_p10 = scmp.lt.s32.totalorder %s2683_s16, %s2683_s16 }
  0x20   : > { %p2686_p5 = pnand %p2684_p2, %p2973_p7  ;;  %p2693_p11 = por %p2692_p10, %p2691_p9 }
  0x22   : > { %p2687_p8 = pneg %p2686_p5 }
  0x24   : > { %p2694_p12 = pnand %p2693_p11, %p2687_p8 }
  0x26   : > { %2697 = shalt.err (!%p2694_p12)
}
  0x27   : > { %2405 = dma.hbm_to_vmem [thread:$0]  (!%p2963_p6), %s3436_s3, 6144, %s2967_s30, [#allocation10], %s3441_s12, %s3441_s12, %s3442_s13  }
  0x28   : > { %s2709_s19 = scalar_lea.vmem %s2969_s9, 6144  ;;  %p2717_p5 = scmp.lt.s32.totalorder %s2969_s9, %s2969_s9 }
  0x29   : > { %p2710_p13 = scmp.ne.s32.totalorder %s2969_s9, %s2709_s19  ;;  %p2718_p8 = scmp.lt.s32.totalorder %s2709_s19, %s2709_s19 }
  0x2b   : > { %p2712_p0 = pnand %p2710_p13, %p2973_p7  ;;  %p2719_p9 = por %p2718_p8, %p2717_p5 }
  0x2d   : > { %p2713_p2 = pneg %p2712_p0 }
  0x2f   : > { %p2720_p10 = pnand %p2719_p9, %p2713_p2 }
  0x31   : > { %2723 = shalt.err (!%p2720_p10)
}
  0x32   : > { %2396 = dma.hbm_to_vmem [thread:$0]  (!%p2963_p6), %s3433_s0, 6144, %s2969_s9, [#allocation4], %s3441_s12, %s3441_s12, %s3442_s13  }
  0x33   : > { %s2887_s28 = smov [#allocation8]   ;;  %s2888_s30 = smov [#allocation11]  }
  0x34   : > { %s225_s29 = sshll.u32 %s2887_s28, 4  ;;  %s251_s8 = sshll.u32 %s2888_s30, 4  ;;  %s226_s29 = int_to_ptr.vmem [resolvable:$true] %s225_s29  ;;  %s252_s8 = int_to_ptr.vmem [resolvable:$true] %s251_s8 }
  0x35   : > { %s2735_s11 = scalar_lea.vmem %s226_s29, 2048  ;;  %p2743_p0 = scmp.lt.s32.totalorder %s226_s29, %s226_s29 }
  0x36   : > { %p2736_p11 = scmp.ne.s32.totalorder %s226_s29, %s2735_s11  ;;  %p2744_p2 = scmp.lt.s32.totalorder %s2735_s11, %s2735_s11 }
  0x38   : > { %p2738_p12 = pnand %p2736_p11, %p2973_p7  ;;  %p2745_p5 = por %p2744_p2, %p2743_p0 }
  0x3a   : > { %p2739_p13 = pneg %p2738_p12 }
  0x3c   : > { %p2746_p8 = pnand %p2745_p5, %p2739_p13 }
  0x3e   : > { %2749 = shalt.err (!%p2746_p8)
}
  0x3f   : > { %2402 = dma.hbm_to_vmem [thread:$0]  (!%p2963_p6), %s3435_s2, 2048, %s226_s29, [#allocation7], %s3441_s12, %s3441_s12, %s3442_s13  }
  0x40   : > { %s2761_s15 = scalar_lea.vmem %s252_s8, 2048  ;;  %p2769_p12 = scmp.lt.s32.totalorder %s252_s8, %s252_s8 }
  0x41   : > { %p2762_p9 = scmp.ne.s32.totalorder %s252_s8, %s2761_s15  ;;  %p2770_p0 = scmp.lt.s32.totalorder %s2761_s15, %s2761_s15 }
  0x43   : > { %p2764_p10 = pnand %p2762_p9, %p2973_p7  ;;  %p2771_p13 = por %p2770_p0, %p2769_p12 }
  0x45   : > { %p2765_p11 = pneg %p2764_p10 }
  0x47   : > { %p2772_p2 = pnand %p2771_p13, %p2765_p11 }
  0x49   : > { %2775 = shalt.err (!%p2772_p2)
}
  0x4a   : > { %2408 = dma.hbm_to_vmem [thread:$0]  (!%p2963_p6), %s3437_s4, 2048, %s252_s8, [#allocation10], %s3441_s12, %s3441_s12, %s3442_s13  }
  0x4b   : > { %s1847_s7 = sadd.s32 4294967294, %s2880_s24   ;;  %s3039_s10 = sadd.s32 1, %s2880_s24  }
  0x4c   : > { %s137_s18 = sadd.s32 1, %s2876_s23  ;;  %s134_s19 = ssub.s32 %s2880_s24, %s3039_s10 }
  0x4d   : > { %p144_p7 = scmp.ne.s32.totalorder %s2876_s23, %s2872_s22  ;;  %p135_p5 = scmp.eq.s32.totalorder %s134_s19, 0 }
  0x4e   : > { %p145_p8 = scmp.eq.s32.totalorder %s2880_s24, 0  ;;  %p150_p9 = scmp.ne.s32.totalorder %s2872_s22, %s2868_s21 }
  0x4f   : > { %p174_p10 = scmp.eq.s32.totalorder %s2949_s25, 3  ;;  %p180_p0 = scmp.eq.s32.totalorder %s1847_s7, 3 }
  0x50   : > { %s3051_s20 = scalar_select %p135_p5, %s2876_s23, %s137_s18  }
  0x51   : > { %p146_p11 = por %p145_p8, %p144_p7  ;;  %p3055_p12 = por %p3440_p1, %p150_p9 }
  0x52   : > { %p3059_p6 = por %p174_p10, %p144_p7  ;;  %p2422_p13 = scmp.lt.s32.totalorder %s2880_s24, 4 }
  0x53   : > { %s3450_s27 = scalar_select %p3055_p12, 1, 0 }
  0x54   : > { %s3451_s28 = scalar_select %p3059_p6, 1, 0 }
  0x55   : > { %s265_s29 = sand.u32 1, %s2876_s23   ;;  %p3065_p2 = por %p180_p0, %p150_p9 }
  0x56   : > { %s1855_s8 = sshll.u32 %s265_s29, 7  ;;  %s1920_s11 = sshll.u32 %s2880_s24, 11 }
  0x57   : > { %s3452_s30 = scalar_select %p3065_p2, 1, 0 }
  0x58   : > { %s3073_s15 = scalar_lea.hbm %s3438_s5, %s1920_s11  ;;  %s269_s16 = scalar_lea.vmem [#allocation12], %s1855_s8 }
  0x59   : > { %s276_s17 = sshll.u32 %s269_s16, 4  ;;  %p3075_p7 = pnand %p2422_p13, %p146_p11  ;;  %s3079_s17 = int_to_ptr.vmem [resolvable:$true] %s276_s17 }
  0x5a   : > { %s3081_s18 = scalar_lea.sflag [#allocation13], %s265_s29  ;;  %s2776_s19 = scalar_lea.hbm %s3073_s15, 2048 }
  0x5b   : > { %p2777_p5 = scmp.ne.s32.totalorder %s3073_s15, %s2776_s19  ;;  %p2778_p8 = pneg %p3075_p7 }
  0x5c   : > { %s2781_s8 = scalar_lea.hbm %s3438_s5, 8192  ;;  %p2782_p11 = scmp.lt.s32.totalorder %s3073_s15, %s3438_s5 }
  0x5d   : > { %p2779_p9 = pnand %p2778_p8, %p2777_p5  ;;  %p2783_p0 = scmp.lt.s32.totalorder %s2781_s8, %s2776_s19 }
  0x5f   : > { %p2780_p10 = pneg %p2779_p9  ;;  %p2784_p13 = por %p2783_p0, %p2782_p11 }
  0x61   : > { %p2785_p3 = pnand %p2784_p13, %p2780_p10 }
  0x63   : > { %2788 = shalt.err (!%p2785_p3)
}
  0x64   : > { %s2789_s29 = scalar_lea.vmem %s3079_s17, 2048  ;;  %s2889_s12 = smov [#allocation12]  }
  0x65   : > { %p2790_p1 = scmp.ne.s32.totalorder %s3079_s17, %s2789_s29  ;;  %s2794_s13 = sshll.u32 %s2889_s12, 4  ;;  %s2795_s13 = int_to_ptr.vmem [resolvable:$false] %s2794_s13 }
  0x66   : > { %s2796_s11 = scalar_lea.vmem %s2795_s13, 4096  ;;  %p2797_p9 = scmp.lt.s32.totalorder %s3079_s17, %s2795_s13 }
  0x67   : > { %p2792_p2 = pnand %p2790_p1, %p2778_p8  ;;  %p2798_p6 = scmp.lt.s32.totalorder %s2796_s11, %s2789_s29 }
  0x69   : > { %p2793_p5 = pneg %p2792_p2  ;;  %p2799_p12 = por %p2798_p6, %p2797_p9 }
  0x6b   : > { %p2800_p4 = pnand %p2799_p12, %p2793_p5 }
  0x6d   : > { %2803 = shalt.err (!%p2800_p4)
}
  0x6e   : > { %s3454_s19 = smov 8   ;;  %s3455_s9 = smov 128  }
  0x6f   : > { %2412 = dma.hbm_to_vmem [thread:$0]  (!%p3075_p7), %s3073_s15, 2048, %s3079_s17, %s3081_s18, %s3455_s9, %s3455_s9, %s3454_s19  }
  0x70   : > { %p3456_p1 = scmp.ne.s32.totalorder %s3447_s26, 0 }
  0x72   : > { %288 = sbr.rel (%p3456_p1) target bundleno = 771 (0x303), region = 44 }
  0x77   : > { %p3457_p3 = scmp.eq.s32.totalorder %s2949_s25, 0 }
  0x79   : > { %2847 = dma.done.wait (%p3457_p3), [#allocation4], 6144   ;;  %p3458_p2 = pmov %p3457_p3 }
  0x7b   : > { %2849 = vsyncadd (%p3458_p2), [#allocation4], 4294961152  ;;  %p3459_p4 = pmov %p3458_p2 }
  0x7c   : > { %p3460_p12 = pmov %p3458_p2 }
  0x7d   : > { %2851 = dma.done.wait (%p3459_p4), [#allocation7], 6144  }
  0x7e   : > { %2853 = vsyncadd (%p3460_p12), [#allocation7], 4294961152  ;;  %p3461_p6 = pmov %p3458_p2 }
  0x7f   : > { %p3462_p7 = pmov %p3458_p2 }
  0x80   : > { %2855 = dma.done.wait (%p3461_p6), [#allocation10], 8192  }
  0x81   : > { %2857 = vsyncadd (%p3462_p7), [#allocation10], 4294959104  ;;  %s3120_s26 = sand.u32 1, %s2872_s22   ;;  %p3463_p8 = scmp.ne.s32.totalorder %s3450_s27, 0 }
  0x82   : > { %s1864_s12 = sshll.u32 %s3120_s26, 7  ;;  %s311_s13 = scalar_lea.sflag [#allocation13], %s3120_s26 }
  0x83   : > { %s3124_s15 = scalar_lea.vmem [#allocation12], %s1864_s12 }
  0x84   : > { %2859 = dma.done.wait (%p3463_p8), %s311_s13, 2048  }
  0x85   : > { %2861 = vsyncadd (%p3463_p8), %s311_s13, 4294965248  ;;  %s1865_s17 = sshll.u32 %s3120_s26, 6  ;;  %p3464_p10 = scmp.ne.s32.totalorder %s2949_s25, 0 }
  0x86   : > { %s3131_s7 = scalar_lea.vmem [#allocation14], %s1865_s17 }
  0x87   : > { %346 = sbr.rel (%p3464_p10) target bundleno = 149 (0x95), region = 72 }
  0x8c   : > { %v347_v0 = vld [vmem:[#allocation11] sm:$0xff]  ;;  %v348_v1 = vld [vmem:[#allocation11 + $0x8] sm:$0xff]  ;;  %v349_v2 = vld [vmem:[#allocation11 + $0x10] sm:$0xff] }
  0x8d   : > { %363 = vst [vmem:[#allocation2 + $0x30] sm:$0xff] %v347_v0  ;;  %364 = vst [vmem:[#allocation2] sm:$0xff] %v348_v1  ;;  %v350_v3 = vld [vmem:[#allocation11 + $0x18] sm:$0xff]  ;;  %v351_v4 = vld [vmem:[#allocation11 + $0x20] sm:$0xff] }
  0x8e   : > { %365 = vst [vmem:[#allocation2 + $0x58] sm:$0xff] %v349_v2  ;;  %v352_v5 = vld [vmem:[#allocation11 + $0x28] sm:$0xff]  ;;  %366 = vst [vmem:[#allocation2 + $0x18] sm:$0xff] %v350_v3  ;;  %v353_v6 = vld [vmem:[#allocation11 + $0x30] sm:$0xff] }
  0x8f   : > { %367 = vst [vmem:[#allocation2 + $0x50] sm:$0xff] %v351_v4  ;;  %368 = vst [vmem:[#allocation2 + $0x68] sm:$0xff] %v352_v5  ;;  %v354_v7 = vld [vmem:[#allocation11 + $0x38] sm:$0xff]  ;;  %v355_v8 = vld [vmem:[#allocation11 + $0x40] sm:$0xff] }
  0x90   : > { %369 = vst [vmem:[#allocation2 + $0x8] sm:$0xff] %v353_v6  ;;  %370 = vst [vmem:[#allocation2 + $0x48] sm:$0xff] %v354_v7  ;;  %v356_v9 = vld [vmem:[#allocation11 + $0x48] sm:$0xff]  ;;  %v357_v10 = vld [vmem:[#allocation11 + $0x50] sm:$0xff] }
  0x91   : > { %371 = vst [vmem:[#allocation2 + $0x40] sm:$0xff] %v355_v8  ;;  %v358_v11 = vld [vmem:[#allocation11 + $0x58] sm:$0xff]  ;;  %372 = vst [vmem:[#allocation2 + $0x20] sm:$0xff] %v356_v9  ;;  %v359_v12 = vld [vmem:[#allocation11 + $0x60] sm:$0xff] }
  0x92   : > { %373 = vst [vmem:[#allocation2 + $0x10] sm:$0xff] %v357_v10  ;;  %374 = vst [vmem:[#allocation2 + $0x38] sm:$0xff] %v358_v11  ;;  %v360_v13 = vld [vmem:[#allocation11 + $0x68] sm:$0xff]  ;;  %v361_v14 = vld [vmem:[#allocation11 + $0x70] sm:$0xff] }
  0x93   : > { %375 = vst [vmem:[#allocation2 + $0x60] sm:$0xff] %v359_v12  ;;  %376 = vst [vmem:[#allocation2 + $0x70] sm:$0xff] %v360_v13  ;;  %v362_v15 = vld [vmem:[#allocation11 + $0x78] sm:$0xff] }
  0x94   : > { %377 = vst [vmem:[#allocation2 + $0x78] sm:$0xff] %v361_v14  ;;  %378 = vst [vmem:[#allocation2 + $0x28] sm:$0xff] %v362_v15 }
  0x95 PF: > { %v458_v16 = vld [vmem:[%s3124_s15 + $0x78] sm:$0xff]  ;;  %v457_v18 = vld [vmem:[%s3124_s15 + $0x70] sm:$0xff]  ;;  %v456_v20 = vld [vmem:[%s3124_s15 + $0x68] sm:$0xff]  ;;  %s1937_s27 = sshll.u32 %s2949_s25, 10  ;;  %s1724_s18 = sshll.u32 %s3131_s7, 4  ;;  %s3390_s18 = int_to_ptr.vmem [resolvable:$true] %s1724_s18 }
  0x96   : > { %2129 = vmatprep.subr.mxu0 %v458_v16  ;;  %v455_v22 = vld [vmem:[%s3124_s15 + $0x60] sm:$0xff]  ;;  %v454_v24 = vld [vmem:[%s3124_s15 + $0x58] sm:$0xff]  ;;  %v453_v26 = vld [vmem:[%s3124_s15 + $0x50] sm:$0xff]  ;;  %s3388_s16 = scalar_lea.hbm %s3439_s6, %s1937_s27  ;;  %s1711_s29 = scalar_lea.sflag [#allocation5], %s3120_s26 }
  0x97   : > { %2130 = vmatpush3.msra.mxu0 %v458_v16  ;;  %v452_v28 = vld [vmem:[%s3124_s15 + $0x48] sm:$0xff]  ;;  %v451_v30 = vld [vmem:[%s3124_s15 + $0x40] sm:$0xff]  ;;  %v450_v32 = vld [vmem:[%s3124_s15 + $0x38] sm:$0xff]  ;;  %s2804_s11 = scalar_lea.vmem %s3390_s18, 1024  ;;  %p3499_p0 = scmp.ne.s32.totalorder %s3451_s28, 0 }
  0x98   : > { %2131 = vmatprep.subr.mxu0 %v457_v18  ;;  %v3164_v29 = vld [vmem:[#allocation2 + $0x20] sm:$0xff]  ;;  %v3174_v33 = vld [vmem:[#allocation2 + $0x48] sm:$0xff]  ;;  %v449_v34 = vld [vmem:[%s3124_s15 + $0x30] sm:$0xff]  ;;  %p2805_p11 = scmp.ne.s32.totalorder %s3390_s18, %s2804_s11  ;;  %s2890_s25 = smov [#allocation14]  }
  0x99   : > { %2132 = vmatpush3.msra.mxu0 %v457_v18  ;;  %v3154_v25 = vld [vmem:[#allocation2 + $0x38] sm:$0xff]  ;;  %v3159_v27 = vld [vmem:[#allocation2 + $0x10] sm:$0xff]  ;;  %v3169_v31 = vld [vmem:[#allocation2 + $0x40] sm:$0xff]  ;;  %s2808_s19 = sshll.u32 %s2890_s25, 4  ;;  %s2809_s19 = int_to_ptr.vmem [resolvable:$false] %s2808_s19 }
  0x9a   : > { %v3144_v21 = vld [vmem:[#allocation2 + $0x70] sm:$0xff]  ;;  %v3149_v23 = vld [vmem:[#allocation2 + $0x60] sm:$0xff]  ;;  %2133 = vmatprep.subr.mxu0 %v456_v20  ;;  %v3179_v35 = vld [vmem:[#allocation2 + $0x8] sm:$0xff]  ;;  %p2806_p13 = pnand %p2805_p11, %p3499_p0  ;;  %s2810_s9 = scalar_lea.vmem %s2809_s19, 2048 }
  0x9b   : > { %v3136_v17 = vld [vmem:[#allocation2 + $0x28] sm:$0xff]  ;;  %v3140_v19 = vld [vmem:[#allocation2 + $0x78] sm:$0xff]  ;;  %2134 = vmatpush3.msra.mxu0 %v456_v20  ;;  %v447_v38 = vld [vmem:[%s3124_s15 + $0x20] sm:$0xff]  ;;  %p2811_p9 = scmp.lt.s32.totalorder %s3390_s18, %s2809_s19  ;;  %p2812_p1 = scmp.lt.s32.totalorder %s2810_s9, %s2804_s11 }
  0x9c   : > { %2233 = vmatprep.subr.mxu1 %v3136_v17  ;;  %2135 = vmatprep.subr.mxu0 %v455_v22  ;;  %v448_v36 = vld [vmem:[%s3124_s15 + $0x28] sm:$0xff]  ;;  %v3189_v39 = vld [vmem:[#allocation2 + $0x50] sm:$0xff]  ;;  %v446_v40 = vld [vmem:[%s3124_s15 + $0x18] sm:$0xff]  ;;  %p2807_p5 = pneg %p2806_p13 }
  0x9d   : > { %2234 = vmatpush3.msra.mxu1 %v3136_v17  ;;  %2136 = vmatpush3.msra.mxu0 %v455_v22  ;;  %v3184_v37 = vld [vmem:[#allocation2 + $0x68] sm:$0xff]  ;;  %v3194_v41 = vld [vmem:[#allocation2 + $0x18] sm:$0xff]  ;;  %v445_v42 = vld [vmem:[%s3124_s15 + $0x10] sm:$0xff]  ;;  %p2813_p3 = por %p2812_p1, %p2811_p9 }
  0x9e   : > { %2235 = vmatprep.subr.mxu1 %v3140_v19  ;;  %2137 = vmatprep.subr.mxu0 %v454_v24  ;;  %v3199_v43 = vld [vmem:[#allocation2 + $0x58] sm:$0xff]  ;;  %v444_v44 = vld [vmem:[%s3124_s15 + $0x8] sm:$0xff]  ;;  %v3204_v45 = vld [vmem:[#allocation2] sm:$0xff] }
  0x9f   : > { %2236 = vmatpush3.msra.mxu1 %v3140_v19  ;;  %2138 = vmatpush3.msra.mxu0 %v454_v24  ;;  %v443_v46 = vld [vmem:[%s3124_s15] sm:$0xff]  ;;  %v3209_v47 = vld [vmem:[#allocation2 + $0x30] sm:$0xff]  ;;  %v396_v50 = vld [vmem:[#allocation3 + $0x8] sm:$0xff]  ;;  %p2814_p2 = pnand %p2813_p3, %p2807_p5 }
  0xa0   : > { %2237 = vmatprep.subr.mxu1 %v3144_v21  ;;  %2139 = vmatprep.subr.mxu0 %v453_v26  ;;  %3465 = vst [vmem:[#allocation20_spill] sm:$0xff] %v3209_v47  ;;  %v395_v48 = vld [vmem:[#allocation3] sm:$0xff]  ;;  %v765_v51 = vld [vmem:[#allocation6 + $0x8] sm:$0xff]  ;;  %v397_v52 = vld [vmem:[#allocation3 + $0x10] sm:$0xff] }
  0xa1   : > { %2238 = vmatpush3.msra.mxu1 %v3144_v21  ;;  %2140 = vmatpush3.msra.mxu0 %v453_v26  ;;  %v764_v49 = vld [vmem:[#allocation6] sm:$0xff]  ;;  %v766_v53 = vld [vmem:[#allocation6 + $0x10] sm:$0xff]  ;;  %v398_v54 = vld [vmem:[#allocation3 + $0x18] sm:$0xff] }
  0xa2   : > { %2239 = vmatprep.subr.mxu1 %v3149_v23  ;;  %2141 = vmatprep.subr.mxu0 %v452_v28  ;;  %v767_v55 = vld [vmem:[#allocation6 + $0x18] sm:$0xff]  ;;  %v399_v56 = vld [vmem:[#allocation3 + $0x20] sm:$0xff]  ;;  %v400_v58 = vld [vmem:[#allocation3 + $0x28] sm:$0xff] }
  0xa3   : > { %2240 = vmatpush3.msra.mxu1 %v3149_v23  ;;  %2142 = vmatpush3.msra.mxu0 %v452_v28  ;;  %v768_v57 = vld [vmem:[#allocation6 + $0x20] sm:$0xff]  ;;  %v769_v59 = vld [vmem:[#allocation6 + $0x28] sm:$0xff]  ;;  %v401_v60 = vld [vmem:[#allocation3 + $0x30] sm:$0xff] }
  0xa4   : > { %2241 = vmatprep.subr.mxu1 %v3154_v25  ;;  %2143 = vmatprep.subr.mxu0 %v451_v30  ;;  %v770_v61 = vld [vmem:[#allocation6 + $0x30] sm:$0xff]  ;;  %v402_v62 = vld [vmem:[#allocation3 + $0x38] sm:$0xff]  ;;  %v403_v0 = vld [vmem:[#allocation3 + $0x40] sm:$0xff] }
  0xa5   : > { %2242 = vmatpush3.msra.mxu1 %v3154_v25  ;;  %2144 = vmatpush3.msra.mxu0 %v451_v30  ;;  %v771_v63 = vld [vmem:[#allocation6 + $0x38] sm:$0xff]  ;;  %v772_v1 = vld [vmem:[#allocation6 + $0x40] sm:$0xff]  ;;  %v404_v2 = vld [vmem:[#allocation3 + $0x48] sm:$0xff] }
  0xa6   : > { %2243 = vmatprep.subr.mxu1 %v3159_v27  ;;  %2145 = vmatprep.subr.mxu0 %v450_v32  ;;  %v773_v3 = vld [vmem:[#allocation6 + $0x48] sm:$0xff]  ;;  %v405_v4 = vld [vmem:[#allocation3 + $0x50] sm:$0xff]  ;;  %v406_v6 = vld [vmem:[#allocation3 + $0x58] sm:$0xff] }
  0xa7   : > { %2244 = vmatpush3.msra.mxu1 %v3159_v27  ;;  %2146 = vmatpush3.msra.mxu0 %v450_v32  ;;  %v774_v5 = vld [vmem:[#allocation6 + $0x50] sm:$0xff]  ;;  %v775_v7 = vld [vmem:[#allocation6 + $0x58] sm:$0xff]  ;;  %v407_v8 = vld [vmem:[#allocation3 + $0x60] sm:$0xff] }
  0xa8   : > { %2245 = vmatprep.subr.mxu1 %v3164_v29  ;;  %2147 = vmatprep.subr.mxu0 %v449_v34  ;;  %v776_v9 = vld [vmem:[#allocation6 + $0x60] sm:$0xff]  ;;  %v408_v10 = vld [vmem:[#allocation3 + $0x68] sm:$0xff]  ;;  %v409_v12 = vld [vmem:[#allocation3 + $0x70] sm:$0xff] }
  0xa9   : > { %2246 = vmatpush3.msra.mxu1 %v3164_v29  ;;  %2148 = vmatpush3.msra.mxu0 %v449_v34  ;;  %v777_v11 = vld [vmem:[#allocation6 + $0x68] sm:$0xff]  ;;  %v778_v13 = vld [vmem:[#allocation6 + $0x70] sm:$0xff]  ;;  %v410_v14 = vld [vmem:[#allocation3 + $0x78] sm:$0xff] }
  0xaa   : > { %2247 = vmatprep.subr.mxu1 %v3169_v31  ;;  %2149 = vmatprep.subr.mxu0 %v448_v36  ;;  %v779_v15 = vld [vmem:[#allocation6 + $0x78] sm:$0xff]  ;;  %v411_v16 = vld [vmem:[#allocation3 + $0x80] sm:$0xff]  ;;  %v412_v20 = vld [vmem:[#allocation3 + $0x88] sm:$0xff] }
  0xab   : > { %2248 = vmatpush3.msra.mxu1 %v3169_v31  ;;  %2150 = vmatpush3.msra.mxu0 %v448_v36  ;;  %v780_v18 = vld [vmem:[#allocation6 + $0x80] sm:$0xff]  ;;  %v781_v22 = vld [vmem:[#allocation6 + $0x88] sm:$0xff]  ;;  %v413_v24 = vld [vmem:[#allocation3 + $0x90] sm:$0xff] }
  0xac   : > { %2249 = vmatprep.subr.mxu1 %v3174_v33  ;;  %2151 = vmatprep.subr.mxu0 %v447_v38  ;;  %v782_v26 = vld [vmem:[#allocation6 + $0x90] sm:$0xff]  ;;  %v414_v28 = vld [vmem:[#allocation3 + $0x98] sm:$0xff]  ;;  %v415_v32 = vld [vmem:[#allocation3 + $0xa0] sm:$0xff] }
  0xad   : > { %2250 = vmatpush3.msra.mxu1 %v3174_v33  ;;  %2152 = vmatpush3.msra.mxu0 %v447_v38  ;;  %v783_v30 = vld [vmem:[#allocation6 + $0x98] sm:$0xff]  ;;  %v784_v34 = vld [vmem:[#allocation6 + $0xa0] sm:$0xff]  ;;  %v416_v36 = vld [vmem:[#allocation3 + $0xa8] sm:$0xff] }
  0xae   : > { %2251 = vmatprep.subr.mxu1 %v3179_v35  ;;  %2153 = vmatprep.subr.mxu0 %v446_v40  ;;  %v785_v38 = vld [vmem:[#allocation6 + $0xa8] sm:$0xff] }
  0xaf   : > { %2252 = vmatpush3.msra.mxu1 %v3179_v35  ;;  %2154 = vmatpush3.msra.mxu0 %v446_v40  ;;  %v417_v40 = vld [vmem:[#allocation3 + $0xb0] sm:$0xff] }
  0xb0   : > { %2253 = vmatprep.subr.mxu1 %v3184_v37  ;;  %2155 = vmatprep.subr.mxu0 %v445_v42 }
  0xb1   : > { %2254 = vmatpush3.msra.mxu1 %v3184_v37  ;;  %2156 = vmatpush3.msra.mxu0 %v445_v42  ;;  %v786_v42 = vld [vmem:[#allocation6 + $0xb0] sm:$0xff] }
  0xb2   : > { %2255 = vmatprep.subr.mxu1 %v3189_v39  ;;  %2157 = vmatprep.subr.mxu0 %v444_v44 }
  0xb3   : > { %2256 = vmatpush3.msra.mxu1 %v3189_v39  ;;  %2158 = vmatpush3.msra.mxu0 %v444_v44  ;;  %v418_v44 = vld [vmem:[#allocation3 + $0xb8] sm:$0xff] }
  0xb4   : > { %2257 = vmatprep.subr.mxu1 %v3194_v41  ;;  %2159 = vmatprep.subr.mxu0 %v443_v46 }
  0xb5   : > { %2258 = vmatpush3.msra.mxu1 %v3194_v41  ;;  %2160 = vmatpush3.msra.mxu0 %v443_v46  ;;  %v787_v46 = vld [vmem:[#allocation6 + $0xb8] sm:$0xff] }
  0xb6   : > { %2259 = vmatprep.subr.mxu1 %v3199_v43  ;;  %2161 = vmatprep.mubr.f32.mxu0 %v395_v48  ;;  %v419_v48 = vld [vmem:[#allocation3 + $0xc0] sm:$0xff] }
  0xb7   : > { %2260 = vmatpush3.msra.mxu1 %v3199_v43  ;;  %2265 = vmatprep.mubr.f32.mxu1 %v764_v49  ;;  %v788_v49 = vld [vmem:[#allocation6 + $0xc0] sm:$0xff] }
  0xb8   : > { %2261 = vmatprep.subr.mxu1 %v3204_v45  ;;  %2162 = vmatmul.mubr.f32.vlgmr.msra.gmra.mxu0 %v396_v50  ;;  %v420_v50 = vld [vmem:[#allocation3 + $0xc8] sm:$0xff] }
  0xb9   : > { %2262 = vmatpush3.msra.mxu1 %v3204_v45  ;;  %2164 = vmatprep.mubr.f32.mxu0 %v397_v52  ;;  %v421_v52 = vld [vmem:[#allocation3 + $0xd0] sm:$0xff] }
  0xba   : > { %2263 = vmatprep.subr.mxu1 %v3209_v47 }
  0xbb   : > { %2264 = vmatpush3.msra.mxu1 %v3209_v47 }
  0xbc   : > { %2266 = vmatmul.mubr.f32.vlgmr.msra.gmra.mxu1 %v765_v51  ;;  %2165 = vmatmul.mubr.f32.gmra.mxu0 %v398_v54  ;;  %v789_v51 = vld [vmem:[#allocation6 + $0xc8] sm:$0xff]  ;;  %v422_v54 = vld [vmem:[#allocation3 + $0xd8] sm:$0xff] }
  0xbd   : > { %2268 = vmatprep.mubr.f32.mxu1 %v766_v53  ;;  %2167 = vmatprep.mubr.f32.mxu0 %v399_v56  ;;  %v790_v53 = vld [vmem:[#allocation6 + $0xd0] sm:$0xff]  ;;  %v423_v56 = vld [vmem:[#allocation3 + $0xe0] sm:$0xff] }
  0xc0   : > { %2269 = vmatmul.mubr.f32.gmra.mxu1 %v767_v55  ;;  %2168 = vmatmul.mubr.f32.gmra.mxu0 %v400_v58  ;;  %v791_v55 = vld [vmem:[#allocation6 + $0xd8] sm:$0xff]  ;;  %v424_v58 = vld [vmem:[#allocation3 + $0xe8] sm:$0xff] }
  0xc1   : > { %2271 = vmatprep.mubr.f32.mxu1 %v768_v57  ;;  %2170 = vmatprep.mubr.f32.mxu0 %v401_v60  ;;  %v792_v57 = vld [vmem:[#allocation6 + $0xe0] sm:$0xff]  ;;  %v425_v60 = vld [vmem:[#allocation3 + $0xf0] sm:$0xff] }
  0xc4   : > { %2272 = vmatmul.mubr.f32.gmra.mxu1 %v769_v59  ;;  %2171 = vmatmul.mubr.f32.gmra.mxu0 %v402_v62  ;;  %v793_v59 = vld [vmem:[#allocation6 + $0xe8] sm:$0xff]  ;;  %v426_v62 = vld [vmem:[#allocation3 + $0xf8] sm:$0xff] }
  0xc5   : > { %2274 = vmatprep.mubr.f32.mxu1 %v770_v61  ;;  %2173 = vmatprep.mubr.f32.mxu0 %v403_v0  ;;  %v794_v61 = vld [vmem:[#allocation6 + $0xf0] sm:$0xff]  ;;  %v427_v0 = vld [vmem:[#allocation3 + $0x100] sm:$0xff] }
  0xc8   : > { %2275 = vmatmul.mubr.f32.gmra.mxu1 %v771_v63  ;;  %2174 = vmatmul.mubr.f32.gmra.mxu0 %v404_v2  ;;  %v795_v63 = vld [vmem:[#allocation6 + $0xf8] sm:$0xff] }
  0xc9   : > { %2277 = vmatprep.mubr.f32.mxu1 %v772_v1  ;;  %2176 = vmatprep.mubr.f32.mxu0 %v405_v4 }
  0xcc   : > { %2278 = vmatmul.mubr.f32.gmra.mxu1 %v773_v3  ;;  %2177 = vmatmul.mubr.f32.gmra.mxu0 %v406_v6  ;;  %v428_v3 = vld [vmem:[#allocation3 + $0x108] sm:$0xff] }
  0xcd   : > { %2280 = vmatprep.mubr.f32.mxu1 %v774_v5  ;;  %2179 = vmatprep.mubr.f32.mxu0 %v407_v8  ;;  %v1341_v8 = vld [vmem:[#allocation8] sm:$0xff] }
  0xd0   : > { %2281 = vmatmul.mubr.f32.gmra.mxu1 %v775_v7  ;;  %2180 = vmatmul.mubr.f32.gmra.mxu0 %v408_v10 }
  0xd1   : > { %2283 = vmatprep.mubr.f32.mxu1 %v776_v9  ;;  %2182 = vmatprep.mubr.f32.mxu0 %v409_v12  ;;  %v429_v9 = vld [vmem:[#allocation3 + $0x110] sm:$0xff]  ;;  %v430_v12 = vld [vmem:[#allocation3 + $0x118] sm:$0xff] }
  0xd4   : > { %2284 = vmatmul.mubr.f32.gmra.mxu1 %v777_v11  ;;  %2183 = vmatmul.mubr.f32.gmra.mxu0 %v410_v14 }
  0xd5   : > { %2286 = vmatprep.mubr.f32.mxu1 %v778_v13  ;;  %2185 = vmatprep.mubr.f32.mxu0 %v411_v16 }
  0xd8   : > { %2287 = vmatmul.mubr.f32.gmra.mxu1 %v779_v15  ;;  %2186 = vmatmul.mubr.f32.gmra.mxu0 %v412_v20 }
  0xd9   : > { %2289 = vmatprep.mubr.f32.mxu1 %v780_v18  ;;  %2188 = vmatprep.mubr.f32.mxu0 %v413_v24  ;;  %v431_v18 = vld [vmem:[#allocation3 + $0x120] sm:$0xff]  ;;  %v432_v24 = vld [vmem:[#allocation3 + $0x128] sm:$0xff] }
  0xdc   : > { %2290 = vmatmul.mubr.f32.gmra.mxu1 %v781_v22  ;;  %2189 = vmatmul.mubr.f32.gmra.mxu0 %v414_v28 }
  0xdd   : > { %2292 = vmatprep.mubr.f32.mxu1 %v782_v26  ;;  %2191 = vmatprep.mubr.f32.mxu0 %v415_v32 }
  0xe0   : > { %2293 = vmatmul.mubr.f32.gmra.mxu1 %v783_v30  ;;  %2192 = vmatmul.mubr.f32.gmra.mxu0 %v416_v36 }
  0xe1   : > { %2295 = vmatprep.mubr.f32.mxu1 %v784_v34  ;;  %2194 = vmatprep.mubr.f32.mxu0 %v417_v40  ;;  %v433_v34 = vld [vmem:[#allocation3 + $0x130] sm:$0xff]  ;;  %v434_v40 = vld [vmem:[#allocation3 + $0x138] sm:$0xff] }
  0xe4   : > { %2296 = vmatmul.mubr.f32.gmra.mxu1 %v785_v38  ;;  %2195 = vmatmul.mubr.f32.gmra.mxu0 %v418_v44 }
  0xe5   : > { %2298 = vmatprep.mubr.f32.mxu1 %v786_v42  ;;  %2197 = vmatprep.mubr.f32.mxu0 %v419_v48 }
  0xe8   : > { %2299 = vmatmul.mubr.f32.gmra.mxu1 %v787_v46  ;;  %2198 = vmatmul.mubr.f32.gmra.mxu0 %v420_v50 }
  0xe9   : > { %2301 = vmatprep.mubr.f32.mxu1 %v788_v49  ;;  %2200 = vmatprep.mubr.f32.mxu0 %v421_v52  ;;  %v435_v49 = vld [vmem:[#allocation3 + $0x140] sm:$0xff]  ;;  %v436_v52 = vld [vmem:[#allocation3 + $0x148] sm:$0xff] }
  0xec   : > { %2302 = vmatmul.mubr.f32.gmra.mxu1 %v789_v51  ;;  %2201 = vmatmul.mubr.f32.gmra.mxu0 %v422_v54 }
  0xed   : > { %2304 = vmatprep.mubr.f32.mxu1 %v790_v53  ;;  %2203 = vmatprep.mubr.f32.mxu0 %v423_v56 }
  0xf0   : > { %2305 = vmatmul.mubr.f32.gmra.mxu1 %v791_v55  ;;  %2204 = vmatmul.mubr.f32.gmra.mxu0 %v424_v58 }
  0xf1   : > { %2307 = vmatprep.mubr.f32.mxu1 %v792_v57  ;;  %2206 = vmatprep.mubr.f32.mxu0 %v425_v60  ;;  %v437_v57 = vld [vmem:[#allocation3 + $0x150] sm:$0xff]  ;;  %v438_v60 = vld [vmem:[#allocation3 + $0x158] sm:$0xff] }
  0xf4   : > { %2308 = vmatmul.mubr.f32.gmra.mxu1 %v793_v59  ;;  %2207 = vmatmul.mubr.f32.gmra.mxu0 %v426_v62 }
  0xf5   : > { %2310 = vmatprep.mubr.f32.mxu1 %v794_v61  ;;  %2209 = vmatprep.mubr.f32.mxu0 %v427_v0 }
  0xf8   : > { %2311 = vmatmul.mubr.f32.gmra.mxu1 %v795_v63  ;;  %2210 = vmatmul.mubr.f32.gmra.mxu0 %v428_v3 }
  0xf9   : > { %2345 = vmatprep.mubr.f32.mxu1 %v1341_v8  ;;  %2212 = vmatprep.mubr.f32.mxu0 %v429_v9 }
  0xfc   : > { %2213 = vmatmul.mubr.f32.gmra.mxu0 %v430_v12 }
  0xfd   : > { %2215 = vmatprep.mubr.f32.mxu0 %v431_v18 }
 0x100   : > { %2216 = vmatmul.mubr.f32.gmra.mxu0 %v432_v24 }
 0x101   : > { %2218 = vmatprep.mubr.f32.mxu0 %v433_v34 }
 0x104   : > { %2219 = vmatmul.mubr.f32.gmra.mxu0 %v434_v40 }
 0x105   : > { %2221 = vmatprep.mubr.f32.mxu0 %v435_v49 }
 0x108   : > { %2222 = vmatmul.mubr.f32.gmra.mxu0 %v436_v52 }
 0x109   : > { %2224 = vmatprep.mubr.f32.mxu0 %v437_v57 }
 0x10c   : > { %2225 = vmatmul.mubr.f32.gmra.mxu0 %v438_v60 }
 0x178   : > { %v2163_v1 = vpop.f32.mrf.mxu0 }
 0x17a   : > { %v525_v5 = vpop.f32.mrf.mxu0 }
 0x17c   : > { %v2267_v2 = vpop.f32.mrf.mxu1  ;;  %v2166_v10 = vpop.f32.mrf.mxu0 }
 0x17d   : > { %v3215_v4 = vadd.f32 %v2267_v2, %v2163_v1  ;;  %v439_v1 = vld [vmem:[#allocation3 + $0x160] sm:$0xff] }
 0x17e   : > { %v862_v6 = vpop.f32.mrf.mxu1  ;;  %v535_v14 = vpop.f32.mrf.mxu0  ;;  %2227 = vmatprep.mubr.f32.mxu0 %v439_v1 }
 0x17f   : > { %3466 = vst [vmem:[#allocation21_spill] sm:$0xff] %v3215_v4  ;;  %v3217_v7 = vadd.f32 %v862_v6, %v525_v5  ;;  %v440_v5 = vld [vmem:[#allocation3 + $0x168] sm:$0xff] }
 0x180   : > { %v2270_v11 = vpop.f32.mrf.mxu1  ;;  %v2169_v20 = vpop.f32.mrf.mxu0  ;;  %2228 = vmatmul.mubr.f32.gmra.mxu0 %v440_v5 }
 0x181   : > { %3467 = vst [vmem:[#allocation22_spill] sm:$0xff] %v3217_v7  ;;  %v3219_v13 = vadd.f32 %v2270_v11, %v2166_v10  ;;  %v441_v10 = vld [vmem:[#allocation3 + $0x170] sm:$0xff] }
 0x182   : > { %v872_v15 = vpop.f32.mrf.mxu1  ;;  %v545_v28 = vpop.f32.mrf.mxu0  ;;  %2230 = vmatprep.mubr.f32.mxu0 %v441_v10  ;;  %v1050_v10 = vld [vmem:[#allocation9 + $0xe8] sm:$0xff] }
 0x183   : > { %3468 = vst [vmem:[#allocation23_spill] sm:$0xff] %v3219_v13  ;;  %v3221_v16 = vadd.f32 %v872_v15, %v535_v14  ;;  %v442_v15 = vld [vmem:[#allocation3 + $0x178] sm:$0xff] }
 0x184   : > { %v2273_v22 = vpop.f32.mrf.mxu1  ;;  %v2172_v36 = vpop.f32.mrf.mxu0  ;;  %2231 = vmatmul.mubr.f32.gmra.mxu0 %v442_v15  ;;  %v1048_v15 = vld [vmem:[#allocation9 + $0xd8] sm:$0xff] }
 0x185   : > { %3469 = vst [vmem:[#allocation24_spill] sm:$0xff] %v3221_v16  ;;  %v3223_v26 = vadd.f32 %v2273_v22, %v2169_v20 }
 0x186   : > { %v882_v30 = vpop.f32.mrf.mxu1  ;;  %v555_v44 = vpop.f32.mrf.mxu0 }
 0x187   : > { %3470 = vst [vmem:[#allocation25_spill] sm:$0xff] %v3223_v26  ;;  %v3225_v32 = vadd.f32 %v882_v30, %v545_v28 }
 0x188   : > { %v2276_v38 = vpop.f32.mrf.mxu1  ;;  %v2175_v50 = vpop.f32.mrf.mxu0 }
 0x189   : > { %3471 = vst [vmem:[#allocation26_spill] sm:$0xff] %v3225_v32  ;;  %v3227_v42 = vadd.f32 %v2276_v38, %v2172_v36  ;;  %v1052_v32 = vld [vmem:[#allocation9 + $0xf8] sm:$0xff] }
 0x18a   : > { %v892_v46 = vpop.f32.mrf.mxu1  ;;  %v565_v54 = vpop.f32.mrf.mxu0 }
 0x18b   : > { %3472 = vst [vmem:[#allocation27_spill] sm:$0xff] %v3227_v42  ;;  %v3229_v48 = vadd.f32 %v892_v46, %v555_v44 }
 0x18c   : > { %v2279_v51 = vpop.f32.mrf.mxu1  ;;  %v2178_v58 = vpop.f32.mrf.mxu0 }
 0x18d   : > { %3473 = vst [vmem:[#allocation28_spill] sm:$0xff] %v3229_v48  ;;  %v3231_v53 = vadd.f32 %v2279_v51, %v2175_v50 }
 0x18e   : > { %v902_v55 = vpop.f32.mrf.mxu1  ;;  %v575_v62 = vpop.f32.mrf.mxu0 }
 0x18f   : > { %3474 = vst [vmem:[#allocation29_spill] sm:$0xff] %v3231_v53  ;;  %v3233_v56 = vadd.f32 %v902_v55, %v565_v54  ;;  %v1047_v53 = vld [vmem:[#allocation9 + $0xd0] sm:$0xff] }
 0x190   : > { %v2282_v59 = vpop.f32.mrf.mxu1  ;;  %v2181_v2 = vpop.f32.mrf.mxu0 }
 0x191   : > { %3475 = vst [vmem:[#allocation30_spill] sm:$0xff] %v3233_v56  ;;  %v3235_v61 = vadd.f32 %v2282_v59, %v2178_v58 }
 0x192   : > { %v912_v63 = vpop.f32.mrf.mxu1  ;;  %v585_v8 = vpop.f32.mrf.mxu0 }
 0x193   : > { %3476 = vst [vmem:[#allocation31_spill] sm:$0xff] %v3235_v61  ;;  %v3237_v0 = vadd.f32 %v912_v63, %v575_v62 }
 0x194   : > { %v2285_v3 = vpop.f32.mrf.mxu1  ;;  %v2184_v12 = vpop.f32.mrf.mxu0 }
 0x195   : > { %3477 = vst [vmem:[#allocation32_spill] sm:$0xff] %v3237_v0  ;;  %v3239_v6 = vadd.f32 %v2285_v3, %v2181_v2 }
 0x196   : > { %v922_v9 = vpop.f32.mrf.mxu1  ;;  %v595_v20 = vpop.f32.mrf.mxu0 }
 0x197   : > { %3478 = vst [vmem:[#allocation33_spill] sm:$0xff] %v3239_v6  ;;  %v3241_v11 = vadd.f32 %v922_v9, %v585_v8 }
 0x198   : > { %v2288_v14 = vpop.f32.mrf.mxu1  ;;  %v3247_v28 = vpop.f32.mrf.mxu0 }
 0x199   : > { %3479 = vst [vmem:[#allocation34_spill] sm:$0xff] %v3241_v11  ;;  %v3243_v18 = vadd.f32 %v2288_v14, %v2184_v12 }
 0x19a   : > { %v932_v22 = vpop.f32.mrf.mxu1  ;;  %v3251_v34 = vpop.f32.mrf.mxu0 }
 0x19b   : > { %3480 = vst [vmem:[#allocation35_spill] sm:$0xff] %v3243_v18  ;;  %v3245_v24 = vadd.f32 %v932_v22, %v595_v20 }
 0x19c   : > { %v3249_v30 = vpop.f32.mrf.mxu1  ;;  %v3255_v38 = vpop.f32.mrf.mxu0 }
 0x19d   : > { %3481 = vst [vmem:[#allocation36_spill] sm:$0xff] %v3245_v24  ;;  %v1049_v24 = vld [vmem:[#allocation9 + $0xe0] sm:$0xff] }
 0x19e   : > { %v3253_v36 = vpop.f32.mrf.mxu1  ;;  %v3259_v44 = vpop.f32.mrf.mxu0 }
 0x1a0   : > { %v3257_v40 = vpop.f32.mrf.mxu1  ;;  %v3263_v49 = vpop.f32.mrf.mxu0 }
 0x1a2   : > { %v3261_v46 = vpop.f32.mrf.mxu1  ;;  %v3267_v51 = vpop.f32.mrf.mxu0 }
 0x1a4   : > { %v3265_v50 = vpop.f32.mrf.mxu1  ;;  %v2196_v54 = vpop.f32.mrf.mxu0 }
 0x1a6   : > { %v3269_v52 = vpop.f32.mrf.mxu1  ;;  %v635_v57 = vpop.f32.mrf.mxu0 }
 0x1a8   : > { %v2300_v55 = vpop.f32.mrf.mxu1  ;;  %v2199_v59 = vpop.f32.mrf.mxu0 }
 0x1aa   : > { %v972_v58 = vpop.f32.mrf.mxu1  ;;  %v645_v62 = vpop.f32.mrf.mxu0 }
 0x1ac   : > { %v2303_v60 = vpop.f32.mrf.mxu1  ;;  %v2202_v1 = vpop.f32.mrf.mxu0 }
 0x1ad   : > { %v1206_v26 = vadd.f32 %v2303_v60, %v2199_v59 }
 0x1ae   : > { %v982_v63 = vpop.f32.mrf.mxu1  ;;  %v655_v3 = vpop.f32.mrf.mxu0 }
 0x1af   : > { %v1205_v4 = vadd.f32 %v982_v63, %v645_v62  ;;  %v1197_v62 = vadd.f32 %v3253_v36, %v3251_v34 }
 0x1b0   : > { %v2306_v2 = vpop.f32.mrf.mxu1  ;;  %v2205_v8 = vpop.f32.mrf.mxu0 }
 0x1b1   : > { %v1208_v12 = vadd.f32 %v2306_v2, %v2202_v1  ;;  %v1051_v1 = vld [vmem:[#allocation9 + $0xf0] sm:$0xff]  ;;  %v1046_v2 = vld [vmem:[#allocation9 + $0xc8] sm:$0xff] }
 0x1b2   : > { %v992_v5 = vpop.f32.mrf.mxu1  ;;  %v665_v20 = vpop.f32.mrf.mxu0 }
 0x1b3   : > { %v1207_v6 = vadd.f32 %v992_v5, %v655_v3  ;;  %v1224_v56 = vadd.f32 %v1208_v12, %v1048_v15  ;;  %v1204_v12 = vadd.f32 %v2300_v55, %v2196_v54  ;;  %v1222_v15 = vadd.f32 %v1206_v26, %v1046_v2  ;;  %v1042_v26 = vld [vmem:[#allocation9 + $0xa8] sm:$0xff] }
 0x1b4   : > { %v2309_v9 = vpop.f32.mrf.mxu1  ;;  %v2208_v0 = vpop.f32.mrf.mxu0 }
 0x1b5   : > { %v1210_v14 = vadd.f32 %v2309_v9, %v2205_v8  ;;  %v1223_v47 = vadd.f32 %v1207_v6, %v1047_v53  ;;  %v1894_v3 = vmul.f32 -1.442695, %v1224_v56  ;;  %v1201_v53 = vadd.f32 %v3269_v52, %v3267_v51  ;;  %v1041_v56 = vld [vmem:[#allocation9 + $0xa0] sm:$0xff]  ;;  %v1038_v52 = vld [vmem:[#allocation9 + $0x88] sm:$0xff] }
 0x1b6   : > { %v1002_v22 = vpop.f32.mrf.mxu1  ;;  %v675_v13 = vpop.f32.mrf.mxu0 }
 0x1b7   : > { %v1226_v18 = vadd.f32 %v1210_v14, %v1050_v10  ;;  %v1209_v11 = vadd.f32 %v1002_v22, %v665_v20  ;;  %v1045_v14 = vld [vmem:[#allocation9 + $0xc0] sm:$0xff]  ;;  %v1893_v59 = vmul.f32 -1.442695, %v1223_v47  ;;  %v1217_v55 = vadd.f32 %v1201_v53, %v1041_v56 }
 0x1b8   : > { %v2312_v61 = vpop.f32.mrf.mxu1 }
 0x1b9   : > { %v1896_v48 = vmul.f32 -1.442695, %v1226_v18  ;;  %v1225_v42 = vadd.f32 %v1209_v11, %v1049_v24  ;;  %v1212_v16 = vadd.f32 %v2312_v61, %v2208_v0  ;;  %v1044_v11 = vld [vmem:[#allocation9 + $0xb8] sm:$0xff]  ;;  %v1203_v61 = vadd.f32 %v972_v58, %v635_v57 }
 0x1ba   : > { %v1012_v7 = vpop.f32.mrf.mxu1  ;;  %v1221_v0 = vadd.f32 %v1205_v4, %v1045_v14  ;;  %v1198_v57 = vadd.f32 %v3249_v30, %v3247_v28  ;;  %v1887_v20 = vmul.f32 -1.442695, %v1217_v55 }
 0x1bb   : > { %v1895_v8 = vmul.f32 -1.442695, %v1225_v42  ;;  %v1211_v9 = vadd.f32 %v1012_v7, %v675_v13  ;;  %v1228_v10 = vadd.f32 %v1212_v16, %v1052_v32  ;;  %2470 = vpow2.f32 %v1896_v48  ;;  %v1043_v13 = vld [vmem:[#allocation9 + $0xb0] sm:$0xff]  ;;  %v1040_v16 = vld [vmem:[#allocation9 + $0x98] sm:$0xff] }
 0x1bc   : > { %v1200_v7 = vadd.f32 %v3257_v40, %v3255_v38  ;;  %v1202_v32 = vadd.f32 %v3265_v50, %v3263_v49  ;;  %v1220_v42 = vadd.f32 %v1204_v12, %v1044_v11  ;;  %v1892_v48 = vmul.f32 -1.442695, %v1222_v15  ;;  %v1039_v49 = vld [vmem:[#allocation9 + $0x90] sm:$0xff] }
 0x1bd   : > { %v1227_v5 = vadd.f32 %v1211_v9, %v1051_v1  ;;  %v1898_v18 = vmul.f32 -1.442695, %v1228_v10  ;;  %2472 = vpow2.f32 %v1895_v8  ;;  %v1219_v4 = vadd.f32 %v1203_v61, %v1043_v13  ;;  %v1037_v1 = vld [vmem:[#allocation9 + $0x80] sm:$0xff] }
 0x1be   : > { %v1891_v47 = vmul.f32 -1.442695, %v1221_v0  ;;  %v1216_v6 = vadd.f32 %v1200_v7, %v1040_v16  ;;  %v1218_v54 = vadd.f32 %v1202_v32, %v1042_v26  ;;  %v1890_v38 = vmul.f32 -1.442695, %v1220_v42 }
 0x1bf   : > { %v1897_v24 = vmul.f32 -1.442695, %v1227_v5  ;;  %2474 = vpow2.f32 %v1898_v18  ;;  %v1199_v40 = vadd.f32 %v3261_v46, %v3259_v44  ;;  %v1889_v50 = vmul.f32 -1.442695, %v1219_v4 }
 0x1c0   : > { %2476 = vpow2.f32 %v1894_v3  ;;  %v1886_v58 = vmul.f32 -1.442695, %v1216_v6  ;;  %v1888_v60 = vmul.f32 -1.442695, %v1218_v54  ;;  %v1214_v46 = vadd.f32 %v1198_v57, %v1038_v52 }
 0x1c1   : > { %2478 = vpow2.f32 %v1897_v24  ;;  %v1215_v63 = vadd.f32 %v1199_v40, %v1039_v49  ;;  %v1213_v9 = vadd.f32 %v1197_v62, %v1037_v1 }
 0x1c2   : > { %2480 = vpow2.f32 %v1893_v59  ;;  %v1884_v36 = vmul.f32 -1.442695, %v1214_v46 }
 0x1c3   : > { %2482 = vpow2.f32 %v1892_v48  ;;  %v1885_v10 = vmul.f32 -1.442695, %v1215_v63  ;;  %v1883_v15 = vmul.f32 -1.442695, %v1213_v9  ;;  %v3482_v9 = vld [vmem:[#allocation20_spill] sm:$0xff] }
 0x1c4   : > { %2484 = vpow2.f32 %v1891_v47 }
 0x1c5   : > { %2486 = vpow2.f32 %v1890_v38 }
 0x1c6   : > { %2488 = vpow2.f32 %v1889_v50 }
 0x1c7   : > { %2490 = vpow2.f32 %v1886_v58 }
 0x1c8   : > { %v2471_v51 = vpop.eup %2470  ;;  %2492 = vpow2.f32 %v1888_v60 }
 0x1c9   : > { %v1290_v2 = vadd.f32 1.0, %v2471_v51  ;;  %2494 = vpow2.f32 %v1887_v20 }
 0x1ca   : > { %v2473_v22 = vpop.eup %2472 }
 0x1cb   : > { %v1289_v14 = vadd.f32 1.0, %v2473_v22 }
 0x1cc   : > { %v2475_v44 = vpop.eup %2474 }
 0x1cd   : > { %v2477_v8 = vpop.eup %2476  ;;  %v1292_v28 = vadd.f32 1.0, %v2475_v44 }
 0x1ce   : > { %v2479_v30 = vpop.eup %2478  ;;  %v1288_v5 = vadd.f32 1.0, %v2477_v8 }
 0x1cf   : > { %2496 = vrcp.f32 %v1292_v28  ;;  %v1291_v3 = vadd.f32 1.0, %v2479_v30  ;;  %v2481_v34 = vpop.eup %2480 }
 0x1d0   : > { %2498 = vrcp.f32 %v1290_v2  ;;  %v2483_v12 = vpop.eup %2482  ;;  %v1287_v18 = vadd.f32 1.0, %v2481_v34  ;;  %v1347_v34 = vld [vmem:[#allocation8 + $0x30] sm:$0xff] }
 0x1d1   : > { %2500 = vrcp.f32 %v1291_v3  ;;  %v2485_v11 = vpop.eup %2484  ;;  %v1286_v24 = vadd.f32 1.0, %v2483_v12  ;;  %v1345_v3 = vld [vmem:[#allocation8 + $0x20] sm:$0xff]  ;;  %v1351_v12 = vld [vmem:[#allocation8 + $0x50] sm:$0xff] }
 0x1d2   : > { %2502 = vpow2.f32 %v1885_v10  ;;  %v2487_v61 = vpop.eup %2486  ;;  %v1285_v0 = vadd.f32 1.0, %v2485_v11  ;;  %v1354_v11 = vld [vmem:[#allocation8 + $0x68] sm:$0xff] }
 0x1d3   : > { %2504 = vrcp.f32 %v1289_v14  ;;  %v2489_v59 = vpop.eup %2488  ;;  %v1284_v13 = vadd.f32 1.0, %v2487_v61  ;;  %v1343_v14 = vld [vmem:[#allocation8 + $0x10] sm:$0xff]  ;;  %v1356_v61 = vld [vmem:[#allocation8 + $0x78] sm:$0xff] }
 0x1d4   : > { %2506 = vpow2.f32 %v1884_v36  ;;  %v2491_v7 = vpop.eup %2490  ;;  %v1283_v42 = vadd.f32 1.0, %v2489_v59  ;;  %v1349_v36 = vld [vmem:[#allocation8 + $0x40] sm:$0xff] }
 0x1d5   : > { %2508 = vrcp.f32 %v1288_v5  ;;  %v2493_v16 = vpop.eup %2492  ;;  %v1280_v55 = vadd.f32 1.0, %v2491_v7  ;;  %v1350_v5 = vld [vmem:[#allocation8 + $0x48] sm:$0xff]  ;;  %v1021_v59 = vld [vmem:[#allocation9] sm:$0xff] }
 0x1d6   : > { %2510 = vpow2.f32 %v1883_v15  ;;  %v2495_v32 = vpop.eup %2494  ;;  %v1282_v53 = vadd.f32 1.0, %v2493_v16  ;;  %v1352_v15 = vld [vmem:[#allocation8 + $0x58] sm:$0xff]  ;;  %v3483_v7 = vld [vmem:[#allocation21_spill] sm:$0xff] }
 0x1d7   : > { %2512 = vrcp.f32 %v1287_v18  ;;  %v1281_v6 = vadd.f32 1.0, %v2495_v32  ;;  %v1353_v18 = vld [vmem:[#allocation8 + $0x60] sm:$0xff]  ;;  %v1024_v16 = vld [vmem:[#allocation9 + $0x18] sm:$0xff]  ;;  %v3484_v32 = vld [vmem:[#allocation22_spill] sm:$0xff] }
 0x1d8   : > { %2514 = vrcp.f32 %v1286_v24  ;;  %v1355_v24 = vld [vmem:[#allocation8 + $0x70] sm:$0xff] }
 0x1d9   : > { %2516 = vrcp.f32 %v1285_v0  ;;  %v1022_v0 = vld [vmem:[#allocation9 + $0x8] sm:$0xff] }
 0x1da   : > { %2518 = vrcp.f32 %v1284_v13  ;;  %v1086_v13 = vadd.f32 %v3483_v7, %v1022_v0  ;;  %v3495_v0 = vld [vmem:[#allocation33_spill] sm:$0xff] }
 0x1db   : > { %2520 = vrcp.f32 %v1283_v42  ;;  %v1085_v42 = vadd.f32 %v3484_v32, %v1021_v59 }
 0x1dc   : > { %v2497_v48 = vpop.eup %2496  ;;  %2522 = vrcp.f32 %v1282_v53  ;;  %v3485_v53 = vld [vmem:[#allocation23_spill] sm:$0xff] }
 0x1dd   : > { %v2499_v26 = vpop.eup %2498  ;;  %v1372_v56 = vmul.f32 %v2497_v48, %v3136_v17  ;;  %2524 = vrcp.f32 %v1281_v6  ;;  %v1023_v48 = vld [vmem:[#allocation9 + $0x10] sm:$0xff]  ;;  %v1867_v6 = vmul.f32 -1.442695, %v1085_v42 }
 0x1de   : > { %v2501_v4 = vpop.eup %2500  ;;  %v1370_v49 = vmul.f32 %v2499_v26, %v3144_v21  ;;  %2526 = vrcp.f32 %v1280_v55  ;;  %v1868_v26 = vmul.f32 -1.442695, %v1086_v13  ;;  %v1036_v13 = vld [vmem:[#allocation9 + $0x78] sm:$0xff]  ;;  %v3496_v42 = vld [vmem:[#allocation34_spill] sm:$0xff] }
 0x1df   : > { %v2503_v47 = vpop.eup %2502  ;;  %2313 = vmatprep.subr.mxu1 %v1372_v56  ;;  %v1371_v54 = vmul.f32 %v2501_v4, %v3140_v19  ;;  %v3302_v4 = vpop.f32.mrf.mxu0 }
 0x1e0   : > { %v2505_v38 = vpop.eup %2504  ;;  %2314 = vmatpush3.msra.mxu1 %v1372_v56  ;;  %v1279_v58 = vadd.f32 1.0, %v2503_v47  ;;  %v1088_v56 = vadd.f32 %v3485_v53, %v1024_v16  ;;  %v1026_v47 = vld [vmem:[#allocation9 + $0x28] sm:$0xff] }
 0x1e1   : > { %v2507_v40 = vpop.eup %2506  ;;  %2315 = vmatprep.subr.mxu1 %v1371_v54  ;;  %v1369_v17 = vmul.f32 %v2505_v38, %v3149_v23 }
 0x1e2   : > { %v2509_v50 = vpop.eup %2508  ;;  %2316 = vmatpush3.msra.mxu1 %v1371_v54  ;;  %v1278_v52 = vadd.f32 1.0, %v2507_v40  ;;  %2528 = vrcp.f32 %v1279_v58  ;;  %v3486_v54 = vld [vmem:[#allocation24_spill] sm:$0xff]  ;;  %v1870_v55 = vmul.f32 -1.442695, %v1088_v56 }
 0x1e3   : > { %v2511_v57 = vpop.eup %2510  ;;  %2317 = vmatprep.subr.mxu1 %v1370_v49  ;;  %v1368_v19 = vmul.f32 %v2509_v50, %v3154_v25  ;;  %v1087_v38 = vadd.f32 %v3486_v54, %v1023_v48  ;;  %v1025_v40 = vld [vmem:[#allocation9 + $0x20] sm:$0xff] }
 0x1e4   : > { %v2513_v51 = vpop.eup %2512  ;;  %2318 = vmatpush3.msra.mxu1 %v1370_v49  ;;  %v1277_v62 = vadd.f32 1.0, %v2511_v57  ;;  %2530 = vrcp.f32 %v1278_v52  ;;  %v3487_v49 = vld [vmem:[#allocation25_spill] sm:$0xff]  ;;  %v3306_v57 = vpop.f32.mrf.mxu0 }
 0x1e5   : > { %2319 = vmatprep.subr.mxu1 %v1369_v17  ;;  %v2515_v60 = vpop.eup %2514  ;;  %v1367_v21 = vmul.f32 %v2513_v51, %v3159_v27  ;;  %v1090_v50 = vadd.f32 %v3487_v49, %v1026_v47  ;;  %v1869_v58 = vmul.f32 -1.442695, %v1087_v38 }
 0x1e6   : > { %2320 = vmatpush3.msra.mxu1 %v1369_v17  ;;  %v2517_v63 = vpop.eup %2516  ;;  %v1366_v23 = vmul.f32 %v2515_v60, %v3164_v29  ;;  %2532 = vrcp.f32 %v1277_v62  ;;  %v3488_v17 = vld [vmem:[#allocation26_spill] sm:$0xff]  ;;  %v3309_v60 = vpop.f32.mrf.mxu0 }
 0x1e7   : > { %2321 = vmatprep.subr.mxu1 %v1368_v19  ;;  %v2519_v20 = vpop.eup %2518  ;;  %v1365_v22 = vmul.f32 %v2517_v63, %v3169_v31  ;;  %2534 = vpow2.f32 %v1868_v26  ;;  %v1089_v51 = vadd.f32 %v3488_v17, %v1025_v40  ;;  %v1872_v52 = vmul.f32 -1.442695, %v1090_v50  ;;  %v1054_v26 = vld [vmem:[#allocation9 + $0x108] sm:$0xff]  ;;  %v1035_v40 = vld [vmem:[#allocation9 + $0x70] sm:$0xff]  ;;  %v1053_v50 = vld [vmem:[#allocation9 + $0x100] sm:$0xff] }
 0x1e8   : > { %2322 = vmatpush3.msra.mxu1 %v1368_v19  ;;  %v2521_v25 = vpop.eup %2520  ;;  %v1364_v1 = vmul.f32 %v2519_v20, %v3174_v33  ;;  %2536 = vpow2.f32 %v1867_v6  ;;  %v1028_v19 = vld [vmem:[#allocation9 + $0x38] sm:$0xff]  ;;  %v3312_v20 = vpop.f32.mrf.mxu0 }
 0x1e9   : > { %2323 = vmatprep.subr.mxu1 %v1367_v21  ;;  %v2523_v44 = vpop.eup %2522  ;;  %v1363_v27 = vmul.f32 %v2521_v25, %v3179_v35  ;;  %2538 = vpow2.f32 %v1870_v55  ;;  %v1871_v62 = vmul.f32 -1.442695, %v1089_v51  ;;  %v3497_v6 = vld [vmem:[#allocation35_spill] sm:$0xff]  ;;  %v1326_v55 = vadd.f32 %v3302_v4, %v1054_v26 }
 0x1ea   : > { %2324 = vmatpush3.msra.mxu1 %v1367_v21  ;;  %v2525_v46 = vpop.eup %2524  ;;  %v1362_v29 = vmul.f32 %v2523_v44, %v3184_v37  ;;  %2540 = vpow2.f32 %v1869_v58  ;;  %v3489_v21 = vld [vmem:[#allocation27_spill] sm:$0xff]  ;;  %v1100_v54 = vadd.f32 %v3497_v6, %v1036_v13  ;;  %v1061_v6 = vld [vmem:[#allocation9 + $0x140] sm:$0xff] }
 0x1eb   : > { %2325 = vmatprep.subr.mxu1 %v1366_v23  ;;  %v2527_v2 = vpop.eup %2526  ;;  %v1361_v31 = vmul.f32 %v2525_v46, %v3189_v39  ;;  %v1342_v39 = vld [vmem:[#allocation8 + $0x8] sm:$0xff]  ;;  %v1092_v63 = vadd.f32 %v3489_v21, %v1028_v19  ;;  %2542 = vpow2.f32 %v1872_v52  ;;  %v3315_v46 = vpop.f32.mrf.mxu0  ;;  %v1056_v58 = vld [vmem:[#allocation9 + $0x118] sm:$0xff]  ;;  %v3498_v19 = vld [vmem:[#allocation36_spill] sm:$0xff] }
 0x1ec   : > { %2326 = vmatpush3.msra.mxu1 %v1366_v23  ;;  %v1360_v33 = vmul.f32 %v2527_v2, %v3194_v41  ;;  %v1344_v41 = vld [vmem:[#allocation8 + $0x18] sm:$0xff]  ;;  %v1027_v23 = vld [vmem:[#allocation9 + $0x30] sm:$0xff]  ;;  %2544 = vpow2.f32 %v1871_v62  ;;  %v3491_v2 = vld [vmem:[#allocation29_spill] sm:$0xff]  ;;  %v1882_v52 = vmul.f32 -1.442695, %v1100_v54  ;;  %v1099_v62 = vadd.f32 %v3498_v19, %v1035_v40 }
 0x1ed   : > { %2327 = vmatprep.subr.mxu1 %v1365_v22  ;;  %v1874_v25 = vmul.f32 -1.442695, %v1092_v63  ;;  %v1325_v63 = vadd.f32 %v1053_v50, %v3306_v57 }
 0x1ee   : > { %2328 = vmatpush3.msra.mxu1 %v1365_v22  ;;  %v1030_v22 = vld [vmem:[#allocation9 + $0x48] sm:$0xff] }
 0x1ef   : > { %2329 = vmatprep.subr.mxu1 %v1364_v1  ;;  %v2529_v8 = vpop.eup %2528  ;;  %2546 = vpow2.f32 %v1874_v25 }
 0x1f0   : > { %2330 = vmatpush3.msra.mxu1 %v1364_v1  ;;  %v1359_v35 = vmul.f32 %v2529_v8, %v3199_v43  ;;  %v1346_v43 = vld [vmem:[#allocation8 + $0x28] sm:$0xff]  ;;  %v3490_v1 = vld [vmem:[#allocation28_spill] sm:$0xff]  ;;  %v1032_v8 = vld [vmem:[#allocation9 + $0x58] sm:$0xff] }
 0x1f1   : > { %2331 = vmatprep.subr.mxu1 %v1363_v27  ;;  %v2531_v28 = vpop.eup %2530  ;;  %v1091_v44 = vadd.f32 %v3490_v1, %v1027_v23  ;;  %v1055_v1 = vld [vmem:[#allocation9 + $0x110] sm:$0xff] }
 0x1f2   : > { %2332 = vmatpush3.msra.mxu1 %v1363_v27  ;;  %v1358_v37 = vmul.f32 %v2531_v28, %v3204_v45  ;;  %v1348_v45 = vld [vmem:[#allocation8 + $0x38] sm:$0xff]  ;;  %v1029_v27 = vld [vmem:[#allocation9 + $0x40] sm:$0xff]  ;;  %v1327_v57 = vadd.f32 %v1055_v1, %v3312_v20 }
 0x1f3   : > { %2333 = vmatprep.subr.mxu1 %v1362_v29  ;;  %v2533_v30 = vpop.eup %2532  ;;  %v1873_v28 = vmul.f32 -1.442695, %v1091_v44  ;;  %v1058_v44 = vld [vmem:[#allocation9 + $0x128] sm:$0xff] }
 0x1f4   : > { %2334 = vmatpush3.msra.mxu1 %v1362_v29  ;;  %v1357_v10 = vmul.f32 %v2533_v30, %v3482_v9  ;;  %v2535_v29 = vpop.eup %2534  ;;  %v1031_v9 = vld [vmem:[#allocation9 + $0x50] sm:$0xff] }
 0x1f5   : > { %2335 = vmatprep.subr.mxu1 %v1361_v31  ;;  %2548 = vpow2.f32 %v1873_v28 }
 0x1f6   : > { %2336 = vmatpush3.msra.mxu1 %v1361_v31  ;;  %v1094_v31 = vadd.f32 %v3491_v2, %v1030_v22  ;;  %v1328_v22 = vadd.f32 %v3309_v60, %v1056_v58  ;;  %v2630_v58 = vld [vmem:[#allocation2] sm:$0xff] }
 0x1f7   : > { %2337 = vmatprep.subr.mxu1 %v1360_v33 }
 0x1f8   : > { %2338 = vmatpush3.msra.mxu1 %v1360_v33  ;;  %v2537_v33 = vpop.eup %2536 }
 0x1f9   : > { %2339 = vmatprep.subr.mxu1 %v1359_v35 }
 0x1fa   : > { %2340 = vmatpush3.msra.mxu1 %v1359_v35  ;;  %v3492_v35 = vld [vmem:[#allocation30_spill] sm:$0xff] }
 0x1fb   : > { %2341 = vmatprep.subr.mxu1 %v1358_v37  ;;  %v1093_v30 = vadd.f32 %v3492_v35, %v1029_v27  ;;  %v1330_v35 = vadd.f32 %v3315_v46, %v1058_v44 }
 0x1fc   : > { %2342 = vmatpush3.msra.mxu1 %v1358_v37  ;;  %v1150_v37 = vadd.f32 1.0, %v2535_v29 }
 0x1fd   : > { %2343 = vmatprep.subr.mxu1 %v1357_v10 }
 0x1fe   : > { %2344 = vmatpush3.msra.mxu1 %v1357_v10  ;;  %v3319_v10 = vpop.f32.mrf.mxu0  ;;  %2550 = vrcp.f32 %v1150_v37 }
 0x1ff   : > { %2346 = vmatmul.mubr.f32.vlgmr.msra.gmra.mxu1 %v1342_v39  ;;  %v2539_v39 = vpop.eup %2538 }
 0x200   : > { %2348 = vmatprep.mubr.f32.mxu1 %v1343_v14  ;;  %v1876_v14 = vmul.f32 -1.442695, %v1094_v31 }
 0x202   : > { %2552 = vpow2.f32 %v1876_v14  ;;  %v1060_v14 = vld [vmem:[#allocation9 + $0x138] sm:$0xff] }
 0x203   : > { %2349 = vmatmul.mubr.f32.gmra.mxu1 %v1344_v41  ;;  %v3493_v41 = vld [vmem:[#allocation31_spill] sm:$0xff] }
 0x204   : > { %2351 = vmatprep.mubr.f32.mxu1 %v1345_v3  ;;  %v1096_v3 = vadd.f32 %v3493_v41, %v1032_v8  ;;  %v1881_v8 = vmul.f32 -1.442695, %v1099_v62 }
 0x207   : > { %2352 = vmatmul.mubr.f32.gmra.mxu1 %v1346_v43  ;;  %v1149_v43 = vadd.f32 1.0, %v2537_v33 }
 0x208   : > { %2354 = vmatprep.mubr.f32.mxu1 %v1347_v34  ;;  %v1034_v34 = vld [vmem:[#allocation9 + $0x68] sm:$0xff] }
 0x209   : > { %v1098_v59 = vadd.f32 %v3495_v0, %v1034_v34  ;;  %2554 = vrcp.f32 %v1149_v43  ;;  %v1062_v0 = vld [vmem:[#allocation9 + $0x148] sm:$0xff] }
 0x20b   : > { %2355 = vmatmul.mubr.f32.gmra.mxu1 %v1348_v45  ;;  %v2541_v45 = vpop.eup %2540  ;;  %v1880_v47 = vmul.f32 -1.442695, %v1098_v59 }
 0x20c   : > { %2357 = vmatprep.mubr.f32.mxu1 %v1349_v36  ;;  %v1875_v36 = vmul.f32 -1.442695, %v1093_v30  ;;  %v1151_v7 = vadd.f32 1.0, %v2541_v45 }
 0x20e   : > { %2556 = vpow2.f32 %v1875_v36 }
 0x20f   : > { %2358 = vmatmul.mubr.f32.gmra.mxu1 %v1350_v5  ;;  %v3494_v5 = vld [vmem:[#allocation32_spill] sm:$0xff] }
 0x210   : > { %2360 = vmatprep.mubr.f32.mxu1 %v1351_v12  ;;  %v1095_v12 = vadd.f32 %v3494_v5, %v1031_v9 }
 0x212   : > { %v1877_v32 = vmul.f32 -1.442695, %v1095_v12 }
 0x213   : > { %2361 = vmatmul.mubr.f32.gmra.mxu1 %v1352_v15  ;;  %v1152_v15 = vadd.f32 1.0, %v2539_v39  ;;  %v1057_v39 = vld [vmem:[#allocation9 + $0x120] sm:$0xff] }
 0x214   : > { %2363 = vmatprep.mubr.f32.mxu1 %v1353_v18  ;;  %v1033_v18 = vld [vmem:[#allocation9 + $0x60] sm:$0xff]  ;;  %v1329_v46 = vadd.f32 %v1057_v39, %v3319_v10 }
 0x215   : > { %v1097_v48 = vadd.f32 %v3496_v42, %v1033_v18  ;;  %2558 = vrcp.f32 %v1152_v15 }
 0x217   : > { %2364 = vmatmul.mubr.f32.gmra.mxu1 %v1354_v11  ;;  %v3323_v11 = vpop.f32.mrf.mxu0  ;;  %v1879_v49 = vmul.f32 -1.442695, %v1097_v48 }
 0x218   : > { %2366 = vmatprep.mubr.f32.mxu1 %v1355_v24  ;;  %v2543_v24 = vpop.eup %2542  ;;  %v1332_v12 = vadd.f32 %v3323_v11, %v1060_v14 }
 0x219   : > { %v2545_v16 = vpop.eup %2544  ;;  %v1154_v53 = vadd.f32 1.0, %v2543_v24  ;;  %v3327_v56 = vpop.f32.mrf.mxu0 }
 0x21a   : > { %v1153_v38 = vadd.f32 1.0, %v2545_v16  ;;  %v2547_v17 = vpop.eup %2546 }
 0x21b   : > { %2367 = vmatmul.mubr.f32.gmra.mxu1 %v1356_v61  ;;  %v1878_v61 = vmul.f32 -1.442695, %v1096_v3  ;;  %v3331_v51 = vpop.f32.mrf.mxu0  ;;  %v1156_v4 = vadd.f32 1.0, %v2547_v17  ;;  %v2549_v27 = vpop.eup %2548 }
 0x21c   : > { %v3338_v31 = vpop.eup %2550  ;;  %v1155_v37 = vadd.f32 1.0, %v2549_v27  ;;  %v1066_v27 = vld [vmem:[#allocation9 + $0x168] sm:$0xff] }
 0x21d   : > { %2560 = vpow2.f32 %v1878_v61  ;;  %v3336_v2 = vpop.f32.mrf.mxu0  ;;  %v2553_v28 = vpop.eup %2552  ;;  %v1059_v61 = vld [vmem:[#allocation9 + $0x130] sm:$0xff] }
 0x21e   : > { %2562 = vrcp.f32 %v1151_v7  ;;  %v3342_v30 = vpop.eup %2554  ;;  %v1158_v45 = vadd.f32 1.0, %v2553_v28  ;;  %v1551_v7 = vsub.f32 1.0, %v3338_v31  ;;  %v1331_v26 = vadd.f32 %v1059_v61, %v3327_v56 }
 0x21f   : > { %2564 = vpow2.f32 %v1877_v32  ;;  %v2557_v41 = vpop.eup %2556  ;;  %v2226_v43 = vpop.f32.mrf.mxu0  ;;  %v1550_v13 = vsub.f32 1.0, %v3342_v30 }
 0x220   : > { %2566 = vrcp.f32 %v1154_v53  ;;  %v1157_v18 = vadd.f32 1.0, %v2557_v41  ;;  %v1567_v17 = vmul.f32 %v2630_v58, %v1551_v7  ;;  %v1068_v7 = vld [vmem:[#allocation9 + $0x178] sm:$0xff] }
 0x221   : > { %2568 = vpow2.f32 %v1880_v47  ;;  %v3352_v32 = vpop.f32.mrf.mxu0  ;;  %v1334_v47 = vadd.f32 %v3331_v51, %v1062_v0 }
 0x222   : > { %2570 = vrcp.f32 %v1153_v38  ;;  %v3344_v34 = vpop.eup %2558 }
 0x223   : > { %2572 = vpow2.f32 %v1879_v49  ;;  %v1553_v40 = vsub.f32 1.0, %v3344_v34  ;;  %v1064_v49 = vld [vmem:[#allocation9 + $0x158] sm:$0xff] }
 0x224   : > { %v1336_v44 = vadd.f32 %v2226_v43, %v1064_v49 }
 0x22a   : > { %v2561_v20 = vpop.eup %2560 }
 0x22b   : > { %v3348_v15 = vpop.eup %2562  ;;  %v1160_v11 = vadd.f32 1.0, %v2561_v20 }
 0x22c   : > { %v2565_v59 = vpop.eup %2564 }
 0x22d   : > { %v3354_v10 = vpop.eup %2566  ;;  %v1159_v38 = vadd.f32 1.0, %v2565_v59 }
 0x22e   : > { %v2569_v48 = vpop.eup %2568 }
 0x22f   : > { %v3358_v54 = vpop.eup %2570  ;;  %v1162_v51 = vadd.f32 1.0, %v2569_v48 }
 0x230   : > { %v2573_v50 = vpop.eup %2572  ;;  %v1554_v61 = vsub.f32 1.0, %v3358_v54 }
 0x240   : > { %v2229_v56 = vpop.f32.mrf.mxu0 }
 0x242   : > { %v745_v39 = vpop.f32.mrf.mxu0 }
 0x244   : > { %v2232_v48 = vpop.f32.mrf.mxu0 }
 0x2bf   : > { %v2347_v21 = vpop.f32.mrf.mxu1 }
 0x2c0   : > { %v1519_v23 = vadd.f32 %v2347_v21, %v1326_v55 }
 0x2c1   : > { %v1439_v25 = vpop.f32.mrf.mxu1 }
 0x2c2   : > { %2574 = vtanh.f32 %v1519_v23  ;;  %v1518_v29 = vadd.f32 %v1439_v25, %v1325_v63  ;;  %v1552_v63 = vsub.f32 1.0, %v3348_v15  ;;  %v1333_v23 = vadd.f32 %v1061_v6, %v3336_v2 }
 0x2c3   : > { %2576 = vpow2.f32 %v1882_v52  ;;  %v2350_v33 = vpop.f32.mrf.mxu1  ;;  %v2631_v52 = vld [vmem:[#allocation2 + $0x30] sm:$0xff] }
 0x2c4   : > { %2578 = vtanh.f32 %v1518_v29  ;;  %v1521_v60 = vadd.f32 %v2350_v33, %v1328_v22  ;;  %v1566_v19 = vmul.f32 %v2631_v52, %v1550_v13  ;;  %v2632_v33 = vld [vmem:[#allocation2 + $0x18] sm:$0xff] }
 0x2c5   : > { %2580 = vrcp.f32 %v1156_v4  ;;  %v1449_v9 = vpop.f32.mrf.mxu1  ;;  %v1569_v28 = vmul.f32 %v2632_v33, %v1553_v40 }
 0x2c6   : > { %2582 = vtanh.f32 %v1521_v60  ;;  %v1520_v3 = vadd.f32 %v1449_v9, %v1327_v57  ;;  %v1555_v57 = vsub.f32 1.0, %v3354_v10 }
 0x2c7   : > { %2584 = vpow2.f32 %v1881_v8  ;;  %v2353_v36 = vpop.f32.mrf.mxu1  ;;  %v1161_v8 = vadd.f32 1.0, %v2573_v50  ;;  %v1340_v50 = vadd.f32 %v2232_v48, %v1068_v7 }
 0x2c8   : > { %2586 = vtanh.f32 %v1520_v3  ;;  %v1523_v5 = vadd.f32 %v2353_v36, %v1330_v35  ;;  %v2633_v3 = vld [vmem:[#allocation2 + $0x58] sm:$0xff]  ;;  %v1338_v36 = vadd.f32 %v2229_v56, %v1066_v27 }
 0x2c9   : > { %2588 = vrcp.f32 %v1155_v37  ;;  %v1459_v24 = vpop.f32.mrf.mxu1  ;;  %v1568_v43 = vmul.f32 %v2633_v3, %v1552_v63 }
 0x2ca   : > { %2590 = vtanh.f32 %v1523_v5  ;;  %v1522_v16 = vadd.f32 %v1459_v24, %v1329_v46 }
 0x2cb   : > { %2592 = vrcp.f32 %v1158_v45  ;;  %v2356_v42 = vpop.f32.mrf.mxu1 }
 0x2cc   : > { %2594 = vtanh.f32 %v1522_v16  ;;  %v1525_v53 = vadd.f32 %v2356_v42, %v1332_v12 }
 0x2cd   : > { %2596 = vrcp.f32 %v1157_v18  ;;  %v1469_v55 = vpop.f32.mrf.mxu1 }
 0x2ce   : > { %2598 = vtanh.f32 %v1525_v53  ;;  %v1524_v62 = vadd.f32 %v1469_v55, %v1331_v26 }
 0x2cf   : > { %v2575_v21 = vpop.eup %2574  ;;  %2600 = vrcp.f32 %v1160_v11  ;;  %v2359_v22 = vpop.f32.mrf.mxu1 }
 0x2d0   : > { %v2577_v4 = vpop.eup %2576  ;;  %v1583_v25 = vmul.f32 %v2575_v21, %v3338_v31  ;;  %2602 = vtanh.f32 %v1524_v62  ;;  %v1527_v1 = vadd.f32 %v2359_v22, %v1334_v47  ;;  %v1063_v31 = vld [vmem:[#allocation9 + $0x150] sm:$0xff] }
 0x2d1   : > { %v2579_v29 = vpop.eup %2578  ;;  %2604 = vrcp.f32 %v1159_v38  ;;  %v1479_v60 = vpop.f32.mrf.mxu1  ;;  %v1164_v41 = vadd.f32 1.0, %v2577_v4  ;;  %v1335_v0 = vadd.f32 %v1063_v31, %v3352_v32  ;;  %v1067_v22 = vld [vmem:[#allocation9 + $0x170] sm:$0xff]  ;;  %v2636_v4 = vld [vmem:[#allocation2 + $0x48] sm:$0xff] }
 0x2d2   : > { %v3365_v35 = vpop.eup %2580  ;;  %v1599_v37 = vadd.f32 %v1583_v25, %v1567_v17  ;;  %v1582_v2 = vmul.f32 %v2579_v29, %v3342_v30  ;;  %2606 = vtanh.f32 %v1527_v1  ;;  %v1526_v9 = vadd.f32 %v1479_v60, %v1333_v23  ;;  %v2634_v30 = vld [vmem:[#allocation2 + $0x68] sm:$0xff]  ;;  %v755_v23 = vpop.f32.mrf.mxu0 }
 0x2d3   : > { %v2583_v14 = vpop.eup %2582  ;;  %2608 = vrcp.f32 %v1162_v51  ;;  %v2362_v45 = vpop.f32.mrf.mxu1  ;;  %v1571_v24 = vmul.f32 %v2634_v30, %v1555_v57  ;;  %v1557_v47 = vsub.f32 1.0, %v3365_v35 }
 0x2d4   : > { %v2585_v20 = vpop.eup %2584  ;;  %1615 = vst [vmem:[#allocation2] sm:$0xff] %v1599_v37  ;;  %v1598_v46 = vadd.f32 %v1582_v2, %v1566_v19  ;;  %v1585_v5 = vmul.f32 %v2583_v14, %v3344_v34  ;;  %2610 = vtanh.f32 %v1526_v9  ;;  %v1529_v12 = vadd.f32 %v2362_v45, %v1336_v44  ;;  %v1065_v34 = vld [vmem:[#allocation9 + $0x160] sm:$0xff] }
 0x2d5   : > { %v2587_v18 = vpop.eup %2586  ;;  %2612 = vrcp.f32 %v1161_v8  ;;  %v1489_v59 = vpop.f32.mrf.mxu1  ;;  %v1163_v53 = vadd.f32 1.0, %v2585_v20  ;;  %v1337_v19 = vadd.f32 %v1065_v34, %v745_v39  ;;  %v1573_v25 = vmul.f32 %v2636_v4, %v1557_v47  ;;  %v2644_v4 = vld [vmem:[#allocation2 + $0x28] sm:$0xff] }
 0x2d6   : > { %v2589_v13 = vpop.eup %2588  ;;  %1614 = vst [vmem:[#allocation2 + $0x30] sm:$0xff] %v1598_v46  ;;  %v1941_v16 = vpack.c.bf16 %v1599_v37, %v1598_v46  ;;  %v1601_v11 = vadd.f32 %v1585_v5, %v1569_v28  ;;  %v1584_v42 = vmul.f32 %v2587_v18, %v3348_v15  ;;  %2614 = vtanh.f32 %v1529_v12  ;;  %v2635_v15 = vld [vmem:[#allocation2 + $0x50] sm:$0xff] }
 0x2d7   : > { %v2591_v26 = vpop.eup %2590  ;;  %2616 = vrcp.f32 %v1164_v41  ;;  %v1528_v6 = vadd.f32 %v1489_v59, %v1335_v0  ;;  %v2365_v38 = vpop.f32.mrf.mxu1  ;;  %v1570_v17 = vmul.f32 %v2635_v15, %v1554_v61  ;;  %v1556_v52 = vsub.f32 1.0, %v2589_v13  ;;  %v2639_v61 = vld [vmem:[#allocation2 + $0x40] sm:$0xff] }
 0x2d8   : > { %v2593_v32 = vpop.eup %2592  ;;  %1942 = vst [vmem:[%s3131_s7] sm:$0xff] %v1941_v16   ;;  %1617 = vst [vmem:[#allocation2 + $0x18] sm:$0xff] %v1601_v11  ;;  %v1600_v40 = vadd.f32 %v1584_v42, %v1568_v43  ;;  %v1587_v55 = vmul.f32 %v2591_v26, %v3354_v10  ;;  %v1531_v49 = vadd.f32 %v2365_v38, %v1338_v36  ;;  %v2638_v36 = vld [vmem:[#allocation2 + $0x20] sm:$0xff]  ;;  %v2640_v42 = vld [vmem:[#allocation2 + $0x38] sm:$0xff] }
 0x2d9   : > { %v2595_v58 = vpop.eup %2594  ;;  %2618 = vtanh.f32 %v1528_v6  ;;  %v1499_v62 = vpop.f32.mrf.mxu1  ;;  %v1559_v33 = vsub.f32 1.0, %v2593_v32  ;;  %v1339_v2 = vadd.f32 %v1067_v22, %v755_v23 }
 0x2da   : > { %v2597_v56 = vpop.eup %2596  ;;  %1616 = vst [vmem:[#allocation2 + $0x58] sm:$0xff] %v1600_v40  ;;  %v1946_v21 = vpack.c.bf16 %v1601_v11, %v1600_v40  ;;  %v1603_v51 = vadd.f32 %v1587_v55, %v1571_v24  ;;  %v1586_v63 = vmul.f32 %v2595_v58, %v3358_v54  ;;  %2620 = vtanh.f32 %v1531_v49  ;;  %v2637_v54 = vld [vmem:[#allocation2 + $0x8] sm:$0xff]  ;;  %v2642_v58 = vld [vmem:[#allocation2 + $0x70] sm:$0xff] }
 0x2db   : > { %v2599_v10 = vpop.eup %2598  ;;  %2622 = vrcp.f32 %v1163_v53  ;;  %v1530_v1 = vadd.f32 %v1499_v62, %v1337_v19  ;;  %v2368_v44 = vpop.f32.mrf.mxu1  ;;  %v1572_v60 = vmul.f32 %v2637_v54, %v1556_v52  ;;  %v1558_v37 = vsub.f32 1.0, %v2597_v56 }
 0x2dc   : > { %v2601_v27 = vpop.eup %2600  ;;  %1978 = vst [vmem:[%s3131_s7 + $0x8] sm:$0xff] %v1946_v21   ;;  %1619 = vst [vmem:[#allocation2 + $0x68] sm:$0xff] %v1603_v51  ;;  %v1602_v29 = vadd.f32 %v1586_v63, %v1570_v17  ;;  %v1589_v8 = vmul.f32 %v2599_v10, %v3365_v35  ;;  %v1533_v28 = vadd.f32 %v2368_v44, %v1340_v50  ;;  %v2643_v63 = vld [vmem:[#allocation2 + $0x60] sm:$0xff] }
 0x2dd   : > { %v2603_v57 = vpop.eup %2602  ;;  %2624 = vtanh.f32 %v1530_v1  ;;  %v1509_v9 = vpop.f32.mrf.mxu1  ;;  %v1575_v20 = vmul.f32 %v2638_v36, %v1559_v33  ;;  %v1561_v5 = vsub.f32 1.0, %v2601_v27  ;;  %v1574_v0 = vmul.f32 %v2639_v61, %v1558_v37  ;;  %v2645_v33 = vld [vmem:[#allocation2 + $0x78] sm:$0xff] }
 0x2de   : > { %v2605_v31 = vpop.eup %2604  ;;  %1618 = vst [vmem:[#allocation2 + $0x50] sm:$0xff] %v1602_v29  ;;  %v1951_v39 = vpack.c.bf16 %v1603_v51, %v1602_v29  ;;  %v1605_v14 = vadd.f32 %v1589_v8, %v1573_v25  ;;  %v1588_v41 = vmul.f32 %v2603_v57, %v2589_v13  ;;  %2626 = vtanh.f32 %v1533_v28 }
 0x2df   : > { %v2607_v3 = vpop.eup %2606  ;;  %v1532_v43 = vadd.f32 %v1509_v9, %v1339_v2  ;;  %v1560_v13 = vsub.f32 1.0, %v2605_v31  ;;  %v1577_v34 = vmul.f32 %v2640_v42, %v1561_v5 }
 0x2e0   : > { %v2609_v45 = vpop.eup %2608  ;;  %1979 = vst [vmem:[%s3131_s7 + $0x10] sm:$0xff] %v1951_v39   ;;  %1621 = vst [vmem:[#allocation2 + $0x48] sm:$0xff] %v1605_v14  ;;  %v1604_v35 = vadd.f32 %v1588_v41, %v1572_v60  ;;  %v1591_v46 = vmul.f32 %v2607_v3, %v2593_v32  ;;  %v2641_v32 = vld [vmem:[#allocation2 + $0x10] sm:$0xff] }
 0x2e1   : > { %v2611_v12 = vpop.eup %2610  ;;  %2628 = vtanh.f32 %v1532_v43  ;;  %v1563_v26 = vsub.f32 1.0, %v2609_v45  ;;  %v1576_v40 = vmul.f32 %v2641_v32, %v1560_v13 }
 0x2e2   : > { %v2613_v18 = vpop.eup %2612  ;;  %1620 = vst [vmem:[#allocation2 + $0x8] sm:$0xff] %v1604_v35  ;;  %v1956_v30 = vpack.c.bf16 %v1605_v14, %v1604_v35  ;;  %v1607_v24 = vadd.f32 %v1591_v46, %v1575_v20  ;;  %v1590_v59 = vmul.f32 %v2611_v12, %v2597_v56 }
 0x2e3   : > { %v2615_v7 = vpop.eup %2614  ;;  %v1562_v49 = vsub.f32 1.0, %v2613_v18  ;;  %v1579_v15 = vmul.f32 %v2642_v58, %v1563_v26 }
 0x2e4   : > { %v2617_v16 = vpop.eup %2616  ;;  %1980 = vst [vmem:[%s3131_s7 + $0x18] sm:$0xff] %v1956_v30   ;;  %1623 = vst [vmem:[#allocation2 + $0x20] sm:$0xff] %v1607_v24  ;;  %v1606_v11 = vadd.f32 %v1590_v59, %v1574_v0  ;;  %v1593_v48 = vmul.f32 %v2615_v7, %v2601_v27 }
 0x2e5   : > { %v1565_v52 = vsub.f32 1.0, %v2617_v16  ;;  %v1578_v23 = vmul.f32 %v2643_v63, %v1562_v49 }
 0x2e6   : > { %v2619_v53 = vpop.eup %2618  ;;  %1622 = vst [vmem:[#allocation2 + $0x40] sm:$0xff] %v1606_v11  ;;  %v1961_v47 = vpack.c.bf16 %v1607_v24, %v1606_v11  ;;  %v1609_v6 = vadd.f32 %v1593_v48, %v1577_v34 }
 0x2e7   : > { %v2621_v38 = vpop.eup %2620  ;;  %v1592_v55 = vmul.f32 %v2619_v53, %v2605_v31  ;;  %v1581_v25 = vmul.f32 %v2644_v4, %v1565_v52 }
 0x2e8   : > { %v2623_v50 = vpop.eup %2622  ;;  %1981 = vst [vmem:[%s3131_s7 + $0x20] sm:$0xff] %v1961_v47   ;;  %1625 = vst [vmem:[#allocation2 + $0x38] sm:$0xff] %v1609_v6  ;;  %v1595_v17 = vmul.f32 %v2621_v38, %v2609_v45 }
 0x2e9   : > { %v1608_v19 = vadd.f32 %v1592_v55, %v1576_v40  ;;  %v1564_v10 = vsub.f32 1.0, %v2623_v50 }
 0x2ea   : > { %v2625_v62 = vpop.eup %2624  ;;  %v1611_v56 = vadd.f32 %v1595_v17, %v1579_v15 }
 0x2eb   : > { %v2627_v21 = vpop.eup %2626  ;;  %1624 = vst [vmem:[#allocation2 + $0x10] sm:$0xff] %v1608_v19  ;;  %v1966_v51 = vpack.c.bf16 %v1609_v6, %v1608_v19  ;;  %v1594_v22 = vmul.f32 %v2625_v62, %v2613_v18  ;;  %v1580_v28 = vmul.f32 %v2645_v33, %v1564_v10 }
 0x2ec   : > { %1627 = vst [vmem:[#allocation2 + $0x70] sm:$0xff] %v1611_v56  ;;  %v1597_v1 = vmul.f32 %v2627_v21, %v2617_v16 }
 0x2ed   : > { %1982 = vst [vmem:[%s3131_s7 + $0x28] sm:$0xff] %v1966_v51   ;;  %v1610_v44 = vadd.f32 %v1594_v22, %v1578_v23 }
 0x2ee   : > { %v2629_v27 = vpop.eup %2628  ;;  %v1613_v29 = vadd.f32 %v1597_v1, %v1581_v25 }
 0x2ef   : > { %1626 = vst [vmem:[#allocation2 + $0x60] sm:$0xff] %v1610_v44  ;;  %v1971_v8 = vpack.c.bf16 %v1611_v56, %v1610_v44  ;;  %v1596_v57 = vmul.f32 %v2629_v27, %v2623_v50 }
 0x2f0   : > { %1629 = vst [vmem:[#allocation2 + $0x28] sm:$0xff] %v1613_v29 }
 0x2f1   : > { %1983 = vst [vmem:[%s3131_s7 + $0x30] sm:$0xff] %v1971_v8   ;;  %v1612_v54 = vadd.f32 %v1596_v57, %v1580_v28 }
 0x2f3   : > { %1628 = vst [vmem:[#allocation2 + $0x78] sm:$0xff] %v1612_v54  ;;  %v1976_v60 = vpack.c.bf16 %v1613_v29, %v1612_v54 }
 0x2f5   : > { %1984 = vst [vmem:[%s3131_s7 + $0x38] sm:$0xff] %v1976_v60  }
 0x2f6   : > { %2817 = shalt.err (!%p2814_p2)
}
 0x2f7   : > { %s2818_s12 = scalar_lea.hbm %s3388_s16, 1024  ;;  %s2822_s17 = scalar_lea.hbm %s3439_s6, 4096 }
 0x2f8   : > { %p2819_p4 = scmp.ne.s32.totalorder %s3388_s16, %s2818_s12  ;;  %p2823_p7 = scmp.lt.s32.totalorder %s3388_s16, %s3439_s6 }
 0x2f9   : > { %p2824_p8 = scmp.lt.s32.totalorder %s2822_s17, %s2818_s12 }
 0x2fa   : > { %p2820_p12 = pnand %p2819_p4, %p3499_p0 }
 0x2fb   : > { %p2825_p10 = por %p2824_p8, %p2823_p7 }
 0x2fc   : > { %p2821_p6 = pneg %p2820_p12 }
 0x2fe   : > { %p2826_p11 = pnand %p2825_p10, %p2821_p6 }
 0x300   : > { %2829 = shalt.err (!%p2826_p11)
}
 0x301   : > { %s2891_s8 = smov 64   ;;  %s2892_s14 = smov 4  }
 0x302   : > { %2391 = dma.vmem_to_hbm [thread:$0]  (%p3499_p0), %s3390_s18, 1024, %s3388_s16, %s1711_s29, %s2891_s8, %s2891_s8, %s2892_s14  }
 0x303 PF: > { %p2428_p13 = scmp.ge.s32.totalorder %s2880_s24, 2  ;;  %s1739_s11 = sand.u32 1, %s2868_s21  }
 0x304   : > { %p3500_p5 = scmp.ne.s32.totalorder %s3452_s30, 0  ;;  %s1740_s25 = scalar_lea.sflag [#allocation5], %s1739_s11 }
 0x306   : > { %p2414_p9 = pnand %p2428_p13, %p3500_p5 }
 0x308   : > { %p2415_p1 = pneg %p2414_p9 }
 0x30a   : > { %2863 = dma.done.wait (%p2415_p1), %s1740_s25, 1024  }
 0x30b   : > { %2865 = vsyncadd (%p2415_p1), %s1740_s25, 4294966272  ;;  %p22_p3 = scmp.ge.s32.totalorder %s3039_s10, 6   ;;  %s3501_s21 = smov %s2872_s22 }
 0x30c   : > { %s3502_s22 = smov %s2876_s23  ;;  %s3503_s23 = smov %s3051_s20 }
 0x30d   : > { %s3504_s24 = smov %s3039_s10  ;;  %24 = sbr.rel (!%p22_p3) target bundleno = 8 (0x8), region = 114 }
 0x312   :  { %1745 = vsyncpa [#allocation4], 1 }
 0x313   :  { %1747 = vsyncpa [#allocation4 + $0x1], 1 }
 0x314   :  { %1748 = vsyncpa [#allocation7], 1 }
 0x315   :  { %1749 = vsyncpa [#allocation10], 1 }
 0x316   :  { %1750 = vsyncpa [#allocation13], 1 }
 0x317   :  { %1752 = vsyncpa [#allocation13 + $0x1], 1 }
 0x318   :  { %1753 = vsyncpa [#allocation5], 1 }
 0x319   :  { %1755 = vsyncpa [#allocation5 + $0x1], 1 }

</bundles_post_ra>
